<compile_context>
chip_gen: v7x
topology: tpu7x:2x2x1
jax: 0.10.0
libtpu: 0.0.40
codegen_flags: <defaults>
</compile_context>

<pallas_src>
import jax
import jax.numpy as jnp
from jax.experimental import pallas as pl
from jax.experimental.pallas import tpu as pltpu


TILE_B = 256          # batch rows per grid step (multiple of 256 for MXU fill)
K_IN = 784            # logical input features
K_PAD = 896           # 7 * 128, lane-aligned padded K
H1 = 128
H2 = 64
N_CLASSES = 2


def simplenet_kernel(x_ref, w1_ref, b1_ref, w2_ref, b2_ref, w3_ref, b3_ref,
                     out_ref):
    """Fused forward: fc1+relu -> fc2+relu -> fc3 -> log_softmax (per tile)."""
    x = x_ref[...]                                                # [TB, 896] bf16

    # fc1 + relu (bf16 operands, f32 accumulate, f32 elementwise)
    h1 = jnp.dot(x, w1_ref[...], preferred_element_type=jnp.float32)
    h1 = jnp.maximum(h1 + b1_ref[...], 0.0)                       # [TB, 128] f32

    # fc2 + relu
    h2 = jnp.dot(h1.astype(jnp.bfloat16), w2_ref[...],
                 preferred_element_type=jnp.float32)
    h2 = jnp.maximum(h2 + b2_ref[...], 0.0)                       # [TB, 64] f32

    # fc3 (tiny 64->2 tail)
    logits = jnp.dot(h2.astype(jnp.bfloat16), w3_ref[...],
                     preferred_element_type=jnp.float32)
    logits = logits + b3_ref[...]                                 # [TB, 2] f32

    # Numerically stable log_softmax over the class axis.
    m = jnp.max(logits, axis=-1, keepdims=True)
    shifted = logits - m
    lse = jnp.log(jnp.sum(jnp.exp(shifted), axis=-1, keepdims=True))
    out_ref[...] = shifted - lse


def _pad_axis(a, target, axis):
    pad = target - a.shape[axis]
    if pad <= 0:
        return a
    widths = [(0, 0)] * a.ndim
    widths[axis] = (0, pad)
    return jnp.pad(a, widths)


def simplenet_forward(x, params, *, tile_b=TILE_B):
    """x: [B, 1, 28, 28] (NCHW) or any shape flattenable to [-1, 784]."""
    w1, b1, w2, b2, w3, b3 = params
    x2d = x.reshape(-1, K_IN)
    batch = x2d.shape[0]

    # Pad batch to a multiple of tile_b and K to 896 (zeros do not change the
    # matmul result); cast streaming/weight operands to bf16.
    padded_b = tile_b * pl.cdiv(batch, tile_b)
    xp = _pad_axis(_pad_axis(x2d.astype(jnp.float32), K_PAD, 1),
                   padded_b, 0).astype(jnp.bfloat16)              # [Bp, 896]
    w1p = _pad_axis(w1.astype(jnp.float32), K_PAD, 0).astype(jnp.bfloat16)
    w2b = w2.astype(jnp.bfloat16)
    w3b = w3.astype(jnp.bfloat16)
    b1f = b1.astype(jnp.float32)
    b2f = b2.astype(jnp.float32)
    b3f = b3.astype(jnp.float32)

    grid = (padded_b // tile_b,)

    bytes_accessed = (
        xp.size * 2 + w1p.size * 2 + w2b.size * 2 + w3b.size * 2
        + b1f.size * 4 + b2f.size * 4 + b3f.size * 4
        + padded_b * N_CLASSES * 4
    )
    flops = 2 * padded_b * (K_PAD * H1 + H1 * H2 + H2 * N_CLASSES)

    out = pl.pallas_call(
        simplenet_kernel,
        out_shape=jax.ShapeDtypeStruct((padded_b, N_CLASSES), jnp.float32),
        grid_spec=pltpu.PrefetchScalarGridSpec(
            num_scalar_prefetch=0,
            grid=grid,
            in_specs=[
                # x: tiled over batch
                pl.BlockSpec((tile_b, K_PAD), lambda i: (i, 0)),
                # weights/biases: constant index_map -> resident across grid
                pl.BlockSpec((K_PAD, H1), lambda i: (0, 0)),
                pl.BlockSpec((1, H1), lambda i: (0, 0)),
                pl.BlockSpec((H1, H2), lambda i: (0, 0)),
                pl.BlockSpec((1, H2), lambda i: (0, 0)),
                pl.BlockSpec((H2, N_CLASSES), lambda i: (0, 0)),
                pl.BlockSpec((1, N_CLASSES), lambda i: (0, 0)),
            ],
            out_specs=pl.BlockSpec((tile_b, N_CLASSES), lambda i: (i, 0)),
        ),
        compiler_params=pltpu.CompilerParams(
            dimension_semantics=("parallel",),
        ),
        cost_estimate=pl.CostEstimate(
            flops=flops,
            transcendentals=3 * padded_b,
            bytes_accessed=bytes_accessed,
        ),
    )(xp, w1p, b1f, w2b, b2f, w3b, b3f)

    return out[:batch]


def init_params(key):
    """Deterministic init matching nn.Linear default (U(-1/sqrt(fan_in), ..))."""
    def linear(key, fan_in, fan_out):
        kw, kb = jax.random.split(key)
        bound = 1.0 / (fan_in ** 0.5)
        # Stored as [in, out] so the kernel computes x @ W directly.
        w = jax.random.uniform(kw, (fan_in, fan_out), jnp.float32,
                               minval=-bound, maxval=bound)
        b = jax.random.uniform(kb, (1, fan_out), jnp.float32,
                               minval=-bound, maxval=bound)
        return w, b

    k1, k2, k3 = jax.random.split(key, 3)
    w1, b1 = linear(k1, K_IN, H1)
    w2, b2 = linear(k2, H1, H2)
    w3, b3 = linear(k3, H2, N_CLASSES)
    return (w1, b1, w2, b2, w3, b3)


if __name__ == "__main__":
    key = jax.random.PRNGKey(0)
    pkey, xkey = jax.random.split(key)

    params = init_params(pkey)
    # Batch of 8 single-channel 28x28 "images" (NCHW), as the module expects.
    x = jax.random.normal(xkey, (8, 1, 28, 28), jnp.float32)

    out = simplenet_forward(x, params)
    out = jax.block_until_ready(out)
    assert out.shape == (8, N_CLASSES)

    w1, b1, w2, b2, w3, b3 = params
    xf = x.reshape(-1, K_IN)

    # Reference A: same bf16-operand / f32-accumulate math in plain JAX.
    def q(a):  # bf16 round-trip
        return a.astype(jnp.bfloat16).astype(jnp.float32)
    hp = jax.lax.Precision.HIGHEST
    h1 = jnp.maximum(jnp.dot(q(xf), q(w1), precision=hp) + b1, 0.0)
    h2 = jnp.maximum(jnp.dot(q(h1), q(w2), precision=hp) + b2, 0.0)
    logits_b = jnp.dot(q(h2), q(w3), precision=hp) + b3
    ref_bf16 = jax.nn.log_softmax(logits_b, axis=1)

    # Reference B: full-precision f32 reference of the original module math.
    h1f = jnp.maximum(jnp.dot(xf, w1, precision=hp) + b1, 0.0)
    h2f = jnp.maximum(jnp.dot(h1f, w2, precision=hp) + b2, 0.0)
    ref_f32 = jax.nn.log_softmax(jnp.dot(h2f, w3, precision=hp) + b3, axis=1)

    assert jnp.allclose(out, ref_bf16, atol=1e-2, rtol=1e-2)
    assert jnp.allclose(out, ref_f32, atol=5e-2, rtol=5e-2)

    print("KERNEL_OK")
</pallas_src>

<mosaic_0001>
module attributes {stable_mosaic.version = 11 : i64} {
  func.func @simplenet_kernel(%arg0: i32, %arg1: memref<256x896xbf16, #tpu.memory_space<vmem>>, %arg2: memref<896x128xbf16, #tpu.memory_space<vmem>>, %arg3: memref<1x128xf32, #tpu.memory_space<vmem>>, %arg4: memref<128x64xbf16, #tpu.memory_space<vmem>>, %arg5: memref<1x64xf32, #tpu.memory_space<vmem>>, %arg6: memref<64x2xbf16, #tpu.memory_space<vmem>>, %arg7: memref<1x2xf32, #tpu.memory_space<vmem>>, %arg8: memref<256x2xf32, #tpu.memory_space<vmem>>) attributes {dimension_semantics = [#tpu.dimension_semantics<parallel>], iteration_bounds = array<i64: 1>, scalar_prefetch = 0 : i64, scratch_operands = 0 : i64, tpu.core_type = #tpu.core_type<tc>, window_params = [{transform_indices = @transform_0, window_bounds = array<i64: 256, 896>}, {pipeline_mode = #tpu.pipeline_mode<synchronous>, transform_indices = @transform_1, window_bounds = array<i64: 896, 128>}, {pipeline_mode = #tpu.pipeline_mode<synchronous>, transform_indices = @transform_2, window_bounds = array<i64: 1, 128>}, {pipeline_mode = #tpu.pipeline_mode<synchronous>, transform_indices = @transform_3, window_bounds = array<i64: 128, 64>}, {pipeline_mode = #tpu.pipeline_mode<synchronous>, transform_indices = @transform_4, window_bounds = array<i64: 1, 64>}, {pipeline_mode = #tpu.pipeline_mode<synchronous>, transform_indices = @transform_5, window_bounds = array<i64: 64, 2>}, {pipeline_mode = #tpu.pipeline_mode<synchronous>, transform_indices = @transform_6, window_bounds = array<i64: 1, 2>}, {transform_indices = @transform_7, window_bounds = array<i64: 256, 2>}]} {
    %c0 = arith.constant 0 : index
    %c0_0 = arith.constant 0 : index
    %0 = vector.load %arg1[%c0, %c0_0] : memref<256x896xbf16, #tpu.memory_space<vmem>>, vector<256x896xbf16>
    %c0_1 = arith.constant 0 : index
    %c0_2 = arith.constant 0 : index
    %1 = vector.load %arg2[%c0_1, %c0_2] : memref<896x128xbf16, #tpu.memory_space<vmem>>, vector<896x128xbf16>
    %cst = arith.constant dense<0.000000e+00> : vector<256x128xf32>
    %2 = tpu.matmul %0, %1, %cst {dimension_numbers = #tpu.dot_dimension_numbers<[1], [0], [0], [1], [0, 0, 1, 1], [], []>} : vector<256x896xbf16>, vector<896x128xbf16>, vector<256x128xf32> -> vector<256x128xf32>
    %c0_3 = arith.constant 0 : index
    %c0_4 = arith.constant 0 : index
    %3 = vector.load %arg3[%c0_3, %c0_4] : memref<1x128xf32, #tpu.memory_space<vmem>>, vector<1x128xf32>
    %4 = vector.broadcast %3 : vector<1x128xf32> to vector<256x128xf32>
    %5 = arith.addf %2, %4 : vector<256x128xf32>
    %cst_5 = arith.constant 0.000000e+00 : f32
    %6 = vector.broadcast %cst_5 : f32 to vector<256x128xf32>
    %7 = arith.maximumf %5, %6 : vector<256x128xf32>
    %8 = arith.truncf %7 : vector<256x128xf32> to vector<256x128xbf16>
    %c0_6 = arith.constant 0 : index
    %c0_7 = arith.constant 0 : index
    %9 = vector.load %arg4[%c0_6, %c0_7] : memref<128x64xbf16, #tpu.memory_space<vmem>>, vector<128x64xbf16>
    %cst_8 = arith.constant dense<0.000000e+00> : vector<256x64xf32>
    %10 = tpu.matmul %8, %9, %cst_8 {dimension_numbers = #tpu.dot_dimension_numbers<[1], [0], [0], [1], [0, 0, 1, 1], [], []>} : vector<256x128xbf16>, vector<128x64xbf16>, vector<256x64xf32> -> vector<256x64xf32>
    %c0_9 = arith.constant 0 : index
    %c0_10 = arith.constant 0 : index
    %11 = vector.load %arg5[%c0_9, %c0_10] : memref<1x64xf32, #tpu.memory_space<vmem>>, vector<1x64xf32>
    %12 = vector.broadcast %11 : vector<1x64xf32> to vector<256x64xf32>
    %13 = arith.addf %10, %12 : vector<256x64xf32>
    %cst_11 = arith.constant 0.000000e+00 : f32
    %14 = vector.broadcast %cst_11 : f32 to vector<256x64xf32>
    %15 = arith.maximumf %13, %14 : vector<256x64xf32>
    %16 = arith.truncf %15 : vector<256x64xf32> to vector<256x64xbf16>
    %c0_12 = arith.constant 0 : index
    %c0_13 = arith.constant 0 : index
    %17 = vector.load %arg6[%c0_12, %c0_13] : memref<64x2xbf16, #tpu.memory_space<vmem>>, vector<64x2xbf16>
    %cst_14 = arith.constant dense<0.000000e+00> : vector<256x2xf32>
    %18 = tpu.matmul %16, %17, %cst_14 {dimension_numbers = #tpu.dot_dimension_numbers<[1], [0], [0], [1], [0, 0, 1, 1], [], []>} : vector<256x64xbf16>, vector<64x2xbf16>, vector<256x2xf32> -> vector<256x2xf32>
    %c0_15 = arith.constant 0 : index
    %c0_16 = arith.constant 0 : index
    %19 = vector.load %arg7[%c0_15, %c0_16] : memref<1x2xf32, #tpu.memory_space<vmem>>, vector<1x2xf32>
    %20 = vector.broadcast %19 : vector<1x2xf32> to vector<256x2xf32>
    %21 = arith.addf %18, %20 : vector<256x2xf32>
    %cst_17 = arith.constant dense<0xFF800000> : vector<256xf32>
    %22 = vector.multi_reduction <maximumf>, %21, %cst_17 [1] : vector<256x2xf32> to vector<256xf32>
    %23 = vector.shape_cast %22 : vector<256xf32> to vector<256x1xf32>
    %24 = vector.broadcast %23 : vector<256x1xf32> to vector<256x2xf32>
    %25 = arith.subf %21, %24 : vector<256x2xf32>
    %26 = math.exp %25 : vector<256x2xf32>
    %cst_18 = arith.constant dense<0.000000e+00> : vector<256xf32>
    %27 = vector.multi_reduction <add>, %26, %cst_18 [1] : vector<256x2xf32> to vector<256xf32>
    %28 = vector.shape_cast %27 : vector<256xf32> to vector<256x1xf32>
    %29 = math.log %28 : vector<256x1xf32>
    %30 = vector.broadcast %29 : vector<256x1xf32> to vector<256x2xf32>
    %31 = arith.subf %25, %30 : vector<256x2xf32>
    %c0_19 = arith.constant 0 : index
    %c0_20 = arith.constant 0 : index
    %32 = vector.load %arg8[%c0_19, %c0_20] : memref<256x2xf32, #tpu.memory_space<vmem>>, vector<256x2xf32>
    tpu.vector_store %arg8[%c0_19, %c0_20], %31 {strides = array<i32>} : memref<256x2xf32, #tpu.memory_space<vmem>>, vector<256x2xf32>,
    return
  }
  func.func @transform_0(%arg0: i32) -> (i32, i32) {
    %c0_i32 = arith.constant 0 : i32
    %c0_i32_0 = arith.constant 0 : i32
    return %arg0, %c0_i32 : i32, i32
  }
  func.func @transform_1(%arg0: i32) -> (i32, i32) {
    %c0_i32 = arith.constant 0 : i32
    %c0_i32_0 = arith.constant 0 : i32
    %c0_i32_1 = arith.constant 0 : i32
    return %c0_i32, %c0_i32_0 : i32, i32
  }
  func.func @transform_2(%arg0: i32) -> (i32, i32) {
    %c0_i32 = arith.constant 0 : i32
    %c0_i32_0 = arith.constant 0 : i32
    %c0_i32_1 = arith.constant 0 : i32
    return %c0_i32, %c0_i32_0 : i32, i32
  }
  func.func @transform_3(%arg0: i32) -> (i32, i32) {
    %c0_i32 = arith.constant 0 : i32
    %c0_i32_0 = arith.constant 0 : i32
    %c0_i32_1 = arith.constant 0 : i32
    return %c0_i32, %c0_i32_0 : i32, i32
  }
  func.func @transform_4(%arg0: i32) -> (i32, i32) {
    %c0_i32 = arith.constant 0 : i32
    %c0_i32_0 = arith.constant 0 : i32
    %c0_i32_1 = arith.constant 0 : i32
    return %c0_i32, %c0_i32_0 : i32, i32
  }
  func.func @transform_5(%arg0: i32) -> (i32, i32) {
    %c0_i32 = arith.constant 0 : i32
    %c0_i32_0 = arith.constant 0 : i32
    %c0_i32_1 = arith.constant 0 : i32
    return %c0_i32, %c0_i32_0 : i32, i32
  }
  func.func @transform_6(%arg0: i32) -> (i32, i32) {
    %c0_i32 = arith.constant 0 : i32
    %c0_i32_0 = arith.constant 0 : i32
    %c0_i32_1 = arith.constant 0 : i32
    return %c0_i32, %c0_i32_0 : i32, i32
  }
  func.func @transform_7(%arg0: i32) -> (i32, i32) {
    %c0_i32 = arith.constant 0 : i32
    %c0_i32_0 = arith.constant 0 : i32
    return %arg0, %c0_i32 : i32, i32
  }
}

</mosaic_0001>

<bundles_post_ra>
// kernel: tpu_custom_call.1
= control target key start
LH: loop header
LB: loop body
LE: loop exit
PB: predicated region body
PF: predicated region fallthrough
CT: control target
= control target key end

     0   :  { %12 = vsyncpa [#allocation3], 0  ;;  %s4941_s0 = inlined_call_operand.hbm [shape: bf16[256,896], index: 0, kind: input, shape index: {}]   ;;  %s4942_s1 = inlined_call_operand.hbm [shape: bf16[896,128], index: 1, kind: input, shape index: {}]   ;;  %s4943_s2 = inlined_call_operand.vmem [shape: f32[1,128], index: 2, kind: input, shape index: {}]   ;;  %s4944_s3 = inlined_call_operand.vmem [shape: bf16[128,64], index: 3, kind: input, shape index: {}]   ;;  %s4945_s4 = inlined_call_operand.vmem [shape: f32[1,64], index: 4, kind: input, shape index: {}]   ;;  %s4946_s5 = inlined_call_operand.vmem [shape: bf16[64,2], index: 5, kind: input, shape index: {}]   ;;  %s4947_s6 = inlined_call_operand.vmem [shape: f32[1,2], index: 6, kind: input, shape index: {}]   ;;  %s4948_s7 = inlined_call_operand.vmem [shape: f32[256,2], index: 7, kind: output, shape index: {}]  }
   0x1   :  { %13 = vsyncpa [#allocation5], 0  ;;  %s4023_s24 = smov [#allocation2]   ;;  %s3975_s28 = scalar_lea.hbm %s4941_s0, 14336 }
   0x2   :  { %s19_s25 = sshll.u32 %s4023_s24, 4  ;;  %p3976_p0 = scmp.ne.s32.totalorder %s4941_s0, %s3975_s28  ;;  %s20_s25 = int_to_ptr.vmem [resolvable:$true] %s19_s25 }
   0x3   :  { %p3979_p1 = scmp.lt.u32.totalorder %s3975_s28, %s4941_s0 }
   0x5   :  { %p3981_p2 = pnand %p3979_p1, %p3976_p0 }
   0x7   :  { %3984 = shalt.err (!%p3981_p2)
}
   0x8   :  { %s3985_s10 = scalar_lea.vmem %s20_s25, 14336  ;;  %p3990_p4 = scmp.lt.s32.totalorder %s20_s25, %s20_s25 }
   0x9   :  { %p3986_p3 = scmp.ne.s32.totalorder %s20_s25, %s3985_s10  ;;  %p3991_p5 = scmp.lt.s32.totalorder %s3985_s10, %s3985_s10 }
   0xb   :  { %p3992_p6 = por %p3991_p5, %p3990_p4 }
   0xd   :  { %p3993_p7 = pnand %p3992_p6, %p3986_p3 }
   0xf   :  { %3996 = shalt.err (!%p3993_p7)
}
  0x10   :  { %s4024_s11 = smov 448   ;;  %s4025_s12 = smov 28  }
  0x11   :  { %25 = dma.hbm_to_vmem [thread:$0]  %s4941_s0, 14336, %s20_s25, [#allocation3], %s4024_s11, %s4024_s11, %s4025_s12  }
  0x12   :  { %s4026_s15 = smov [#allocation4]   ;;  %s3997_s19 = scalar_lea.hbm %s4942_s1, 7168 }
  0x13   :  { %s31_s16 = sshll.u32 %s4026_s15, 4  ;;  %p3998_p8 = scmp.ne.s32.totalorder %s4942_s1, %s3997_s19  ;;  %s32_s16 = int_to_ptr.vmem [resolvable:$true] %s31_s16 }
  0x14   :  { %p4001_p9 = scmp.lt.u32.totalorder %s3997_s19, %s4942_s1 }
  0x16   :  { %p4003_p10 = pnand %p4001_p9, %p3998_p8 }
  0x18   :  { %4006 = shalt.err (!%p4003_p10)
}
  0x19   :  { %s4007_s24 = scalar_lea.vmem %s32_s16, 7168  ;;  %p4012_p12 = scmp.lt.s32.totalorder %s32_s16, %s32_s16 }
  0x1a   :  { %p4008_p11 = scmp.ne.s32.totalorder %s32_s16, %s4007_s24  ;;  %p4013_p13 = scmp.lt.s32.totalorder %s4007_s24, %s4007_s24 }
  0x1c   :  { %p4014_p0 = por %p4013_p13, %p4012_p12 }
  0x1e   :  { %p4015_p1 = pnand %p4014_p0, %p4008_p11 }
  0x20   :  { %4018 = shalt.err (!%p4015_p1)
}
  0x21   :  { %s4027_s0 = smov 64   ;;  %s4028_s25 = smov 4  }
  0x22   :  { %37 = dma.hbm_to_vmem [thread:$0]  %s4942_s1, 7168, %s32_s16, [#allocation5], %s4027_s0, %s4027_s0, %s4028_s25  }
  0x23   :  { %4019 = dma.done.wait [#allocation3], 14336  }
  0x24   :  { %4020 = vsyncadd [#allocation3], 4294952960 }
  0x25   :  { %4021 = dma.done.wait [#allocation5], 7168  }
  0x26   :  { %4022 = vsyncadd [#allocation5], 4294960128  ;;  %v3619_v0 = vld [vmem:[#allocation4 + $0x40] sm:$0xff]   ;;  %v3621_v2 = vld [vmem:[#allocation4 + $0x48] sm:$0xff]   ;;  %vm2225_vm0 = vcmask 523264   ;;  %vm2435_vm1 = vcmask 15360  }
  0x27   :  { %v3620_v1 = vld [vmem:[#allocation4] sm:$0xff]   ;;  %3057 = vmatprep.subr.bf16.mxu0 %v3619_v0  ;;  %3597 = vmatprep.subr.bf16.mxu1 %v3619_v0  ;;  %v3622_v3 = vld [vmem:[#allocation4 + $0x8] sm:$0xff]   ;;  %v3623_v4 = vld [vmem:[#allocation4 + $0x50] sm:$0xff]  }
  0x28   :  { %3058 = vmatpush3.bf16.msra.mxu0 %v3620_v1  ;;  %3605 = vmatpush3.bf16.msra.mxu1 %v3620_v1  ;;  %v3624_v5 = vld [vmem:[#allocation4 + $0x10] sm:$0xff]   ;;  %v3625_v6 = vld [vmem:[#allocation4 + $0x58] sm:$0xff]   ;;  %v3627_v8 = vld [vmem:[#allocation4 + $0x60] sm:$0xff]  }
  0x29   :  { %3059 = vmatprep.subr.bf16.mxu0 %v3621_v2  ;;  %3598 = vmatprep.subr.bf16.mxu1 %v3621_v2  ;;  %v3626_v7 = vld [vmem:[#allocation4 + $0x18] sm:$0xff]   ;;  %v3628_v9 = vld [vmem:[#allocation4 + $0x20] sm:$0xff]   ;;  %v3629_v10 = vld [vmem:[#allocation4 + $0x68] sm:$0xff]  }
  0x2a   :  { %v3637_v11 = vld [vmem:[#allocation2 + $0x4] ss:$28 sps:$4 sm:$0xff]   ;;  %v3630_v13 = vld [vmem:[#allocation4 + $0x28] sm:$0xff]   ;;  %v3631_v14 = vld [vmem:[#allocation4 + $0x70] sm:$0xff]  }
  0x2b   :  { %v3640_v12 = vld [vmem:[#allocation2 + $0x2a4] ss:$28 sps:$4 sm:$0xff]   ;;  %1246 = vmatprep.mubr.bf16.mxu0 %v3637_v11  ;;  %v3632_v15 = vld [vmem:[#allocation4 + $0x30] sm:$0xff]   ;;  %v3633_v16 = vld [vmem:[#allocation4 + $0x78] sm:$0xff]  }
  0x2c   :  { %3060 = vmatpush3.bf16.msra.mxu0 %v3622_v3  ;;  %3606 = vmatpush3.bf16.msra.mxu1 %v3622_v3  ;;  %v3634_v17 = vld [vmem:[#allocation4 + $0x38] sm:$0xff]   ;;  %v3641_v18 = vld [vmem:[#allocation4 + $0xc0] sm:$0xff]   ;;  %v3645_v24 = vld [vmem:[#allocation4 + $0xc8] sm:$0xff]  }
  0x2d   :  { %3061 = vmatprep.subr.bf16.mxu0 %v3623_v4  ;;  %3599 = vmatprep.subr.bf16.mxu1 %v3623_v4  ;;  %v3635_v19 = vld [vmem:[#allocation2] ss:$28 sps:$4 sm:$0xff]   ;;  %v3656_v27 = vld [vmem:[#allocation4 + $0x148] sm:$0xff]   ;;  %v3651_v30 = vld [vmem:[#allocation2 + $0x38] ss:$28 sps:$4 sm:$0xff]  }
  0x2e   :  { %1342 = vmatprep.mubr.bf16.mxu1 %v3640_v12  ;;  %v3638_v20 = vld [vmem:[#allocation2 + $0x2a0] ss:$28 sps:$4 sm:$0xff]   ;;  %v3646_v28 = vld [vmem:[#allocation4 + $0x88] sm:$0xff]   ;;  %v3652_v31 = vld [vmem:[#allocation2 + $0x2d8] ss:$28 sps:$4 sm:$0xff]  }
  0x2f   :  { %v3642_v21 = vld [vmem:[#allocation4 + $0x140] sm:$0xff]   ;;  %v3647_v25 = vld [vmem:[#allocation2 + $0x3c] ss:$28 sps:$4 sm:$0xff]   ;;  %v3658_v29 = vld [vmem:[#allocation4 + $0x108] sm:$0xff]  }
  0x30   :  { %3062 = vmatpush3.bf16.msra.mxu0 %v3624_v5  ;;  %3607 = vmatpush3.bf16.msra.mxu1 %v3624_v5  ;;  %v3643_v22 = vld [vmem:[#allocation4 + $0x80] sm:$0xff]   ;;  %v3649_v26 = vld [vmem:[#allocation2 + $0x2dc] ss:$28 sps:$4 sm:$0xff]   ;;  %v3653_v32 = vld [vmem:[#allocation4 + $0xd0] sm:$0xff]  }
  0x31   :  { %3063 = vmatprep.subr.bf16.mxu0 %v3625_v6  ;;  %3600 = vmatprep.subr.bf16.mxu1 %v3625_v6  ;;  %v3644_v23 = vld [vmem:[#allocation4 + $0x100] sm:$0xff]   ;;  %v3654_v33 = vld [vmem:[#allocation4 + $0x90] sm:$0xff]   ;;  %v3655_v34 = vld [vmem:[#allocation4 + $0xd8] sm:$0xff]  }
  0x32   :  { %v3659_v35 = vld [vmem:[#allocation2 + $0x74] ss:$28 sps:$4 sm:$0xff]   ;;  %v3657_v37 = vld [vmem:[#allocation4 + $0x98] sm:$0xff]   ;;  %v3665_v38 = vld [vmem:[#allocation4 + $0xe0] sm:$0xff]  }
  0x33   :  { %v3661_v36 = vld [vmem:[#allocation2 + $0x314] ss:$28 sps:$4 sm:$0xff]   ;;  %v3666_v42 = vld [vmem:[#allocation4 + $0xa0] sm:$0xff]   ;;  %v3667_v43 = vld [vmem:[#allocation4 + $0xe8] sm:$0xff]  }
  0x34   :  { %3064 = vmatpush3.bf16.msra.mxu0 %v3626_v7  ;;  %3608 = vmatpush3.bf16.msra.mxu1 %v3626_v7  ;;  %v3663_v39 = vld [vmem:[#allocation2 + $0x70] ss:$28 sps:$4 sm:$0xff]   ;;  %v3673_v48 = vld [vmem:[#allocation2 + $0xa8] ss:$28 sps:$4 sm:$0xff]   ;;  %v3688_v52 = vld [vmem:[#allocation4 + $0x158] sm:$0xff]  }
  0x35   :  { %3065 = vmatprep.subr.bf16.mxu0 %v3627_v8  ;;  %3601 = vmatprep.subr.bf16.mxu1 %v3627_v8  ;;  %v3664_v40 = vld [vmem:[#allocation2 + $0x310] ss:$28 sps:$4 sm:$0xff]   ;;  %v3674_v49 = vld [vmem:[#allocation2 + $0x348] ss:$28 sps:$4 sm:$0xff]   ;;  %v3689_v53 = vld [vmem:[#allocation4 + $0x118] sm:$0xff]  }
  0x36   :  { %v3676_v41 = vld [vmem:[#allocation4 + $0x150] sm:$0xff]   ;;  %v3669_v45 = vld [vmem:[#allocation2 + $0xac] ss:$28 sps:$4 sm:$0xff]   ;;  %v3681_v54 = vld [vmem:[#allocation2 + $0xe4] ss:$28 sps:$4 sm:$0xff]  }
  0x37   :  { %v3678_v44 = vld [vmem:[#allocation4 + $0x110] sm:$0xff]   ;;  %v3671_v46 = vld [vmem:[#allocation2 + $0x34c] ss:$28 sps:$4 sm:$0xff]   ;;  %v3679_v55 = vld [vmem:[#allocation4 + $0xf8] sm:$0xff]  }
  0x38   :  { %3066 = vmatpush3.bf16.msra.mxu0 %v3628_v9  ;;  %3609 = vmatpush3.bf16.msra.mxu1 %v3628_v9  ;;  %v3668_v47 = vld [vmem:[#allocation4 + $0xa8] sm:$0xff]   ;;  %v3675_v50 = vld [vmem:[#allocation4 + $0xf0] sm:$0xff]   ;;  %v3680_v57 = vld [vmem:[#allocation4 + $0xb8] sm:$0xff]  }
  0x39   :  { %3067 = vmatprep.subr.bf16.mxu0 %v3629_v10  ;;  %3602 = vmatprep.subr.bf16.mxu1 %v3629_v10  ;;  %v3677_v51 = vld [vmem:[#allocation4 + $0xb0] sm:$0xff]   ;;  %v3685_v56 = vld [vmem:[#allocation2 + $0xc] ss:$28 sps:$4 sm:$0xff]   ;;  %v3687_v58 = vld [vmem:[#allocation4 + $0x180] sm:$0xff]  }
  0x3a   :  { %v3683_v59 = vld [vmem:[#allocation2 + $0x8] ss:$28 sps:$4 sm:$0xff]   ;;  %v3686_v62 = vld [vmem:[#allocation2 + $0xe0] ss:$28 sps:$4 sm:$0xff]   ;;  %v3694_v4 = vld [vmem:[#allocation2 + $0x118] ss:$28 sps:$4 sm:$0xff]  }
  0x3b   :  { %v3702_v60 = vld [vmem:[#allocation4 + $0x160] sm:$0xff]   ;;  %v3690_v63 = vld [vmem:[#allocation2 + $0x11c] ss:$28 sps:$4 sm:$0xff]   ;;  %v3704_v1 = vld [vmem:[#allocation4 + $0x188] sm:$0xff]  }
  0x3c   :  { %3068 = vmatpush3.bf16.msra.mxu0 %v3630_v13  ;;  %3610 = vmatpush3.bf16.msra.mxu1 %v3630_v13  ;;  %v3703_v61 = vld [vmem:[#allocation4 + $0x120] sm:$0xff]   ;;  %v3711_v2 = vld [vmem:[#allocation4 + $0x168] sm:$0xff]   ;;  %v3696_v6 = vld [vmem:[#allocation2 + $0x154] ss:$28 sps:$4 sm:$0xff]  }
  0x3d   :  { %3069 = vmatprep.subr.bf16.mxu0 %v3631_v14  ;;  %3603 = vmatprep.subr.bf16.mxu1 %v3631_v14  ;;  %v3692_v0 = vld [vmem:[#allocation2 + $0x44] ss:$28 sps:$4 sm:$0xff]   ;;  %v3712_v3 = vld [vmem:[#allocation4 + $0x128] sm:$0xff]   ;;  %v3719_v7 = vld [vmem:[#allocation4 + $0x190] sm:$0xff]  }
  0x3e   :  { %v3695_v5 = vld [vmem:[#allocation2 + $0x40] ss:$28 sps:$4 sm:$0xff]   ;;  %v3726_v9 = vld [vmem:[#allocation4 + $0x170] sm:$0xff]   ;;  %v3705_v13 = vld [vmem:[#allocation2 + $0x18c] ss:$28 sps:$4 sm:$0xff]  }
  0x3f   :  { %v3698_v8 = vld [vmem:[#allocation2 + $0x7c] ss:$28 sps:$4 sm:$0xff]   ;;  %v3727_v10 = vld [vmem:[#allocation4 + $0x130] sm:$0xff]  }
  0x40   :  { %3070 = vmatpush3.bf16.msra.mxu0 %v3632_v15  ;;  %3611 = vmatpush3.bf16.msra.mxu1 %v3632_v15  ;;  %v3700_v11 = vld [vmem:[#allocation2 + $0x150] ss:$28 sps:$4 sm:$0xff]   ;;  %v3701_v12 = vld [vmem:[#allocation2 + $0x78] ss:$28 sps:$4 sm:$0xff]  }
  0x41   :  { %3071 = vmatprep.subr.bf16.mxu0 %v3633_v16  ;;  %3604 = vmatprep.subr.bf16.mxu1 %v3633_v16  ;;  %v3707_v14 = vld [vmem:[#allocation2 + $0xb4] ss:$28 sps:$4 sm:$0xff]   ;;  %v3734_v15 = vld [vmem:[#allocation4 + $0x198] sm:$0xff]  }
  0x42   :  { %v3735_v16 = vld [vmem:[#allocation4 + $0x178] sm:$0xff]  }
  0x44   :  { %3072 = vmatpush3.bf16.msra.mxu0 %v3634_v17  ;;  %3612 = vmatpush3.bf16.msra.mxu1 %v3634_v17  ;;  %v3736_v17 = vld [vmem:[#allocation4 + $0x138] sm:$0xff]  }
  0x45   :  { %3169 = vmatprep.subr.bf16.mxu1 %v3641_v18  ;;  %3281 = vmatprep.subr.bf16.mxu0 %v3642_v21  ;;  %v3709_v18 = vld [vmem:[#allocation2 + $0x188] ss:$28 sps:$4 sm:$0xff]  }
  0x46   :  { %v3715_v21 = vld [vmem:[#allocation2 + $0xec] ss:$28 sps:$4 sm:$0xff]  }
  0x47   :  { %1247 = vmatmul.mubr.bf16.vlgmr.msra.gmra.mrb[0].mxu0 %v3635_v19  ;;  %1343 = vmatmul.mubr.bf16.vlgmr.msra.gmra.mrb[0].mxu1 %v3638_v20  ;;  %v3710_v19 = vld [vmem:[#allocation2 + $0xb0] ss:$28 sps:$4 sm:$0xff]   ;;  %v3713_v20 = vld [vmem:[#allocation2 + $0x1c4] ss:$28 sps:$4 sm:$0xff]  }
  0x48   :  { %3170 = vmatpush3.bf16.msra.mxu1 %v3643_v22  ;;  %3282 = vmatpush3.bf16.msra.mxu0 %v3644_v23  ;;  %v3749_v22 = vld [vmem:[#allocation4 + $0x1a0] sm:$0xff]  }
  0x49   :  { %3171 = vmatprep.subr.bf16.mxu1 %v3645_v24  ;;  %1254 = vmatprep.mubr.bf16.mxu0 %v3647_v25  ;;  %v3717_v23 = vld [vmem:[#allocation2 + $0x1c0] ss:$28 sps:$4 sm:$0xff]   ;;  %v3718_v24 = vld [vmem:[#allocation2 + $0xe8] ss:$28 sps:$4 sm:$0xff]  }
  0x4a   :  { %1350 = vmatprep.mubr.bf16.mxu1 %v3649_v26  ;;  %3283 = vmatprep.subr.bf16.mxu0 %v3656_v27  ;;  %v3762_v25 = vld [vmem:[#allocation4 + $0x1a8] sm:$0xff]   ;;  %v3720_v26 = vld [vmem:[#allocation2 + $0x1fc] ss:$28 sps:$4 sm:$0xff]   ;;  %v3722_v27 = vld [vmem:[#allocation2 + $0x124] ss:$28 sps:$4 sm:$0xff]  }
  0x4c   :  { %3172 = vmatpush3.bf16.msra.mxu1 %v3646_v28  ;;  %3284 = vmatpush3.bf16.msra.mxu0 %v3658_v29  ;;  %v3775_v28 = vld [vmem:[#allocation4 + $0x1b0] sm:$0xff]  }
  0x4d   :  { %3173 = vmatprep.subr.bf16.mxu1 %v3653_v32  ;;  %3285 = vmatprep.subr.bf16.mxu0 %v3676_v41  ;;  %v3724_v29 = vld [vmem:[#allocation2 + $0x1f8] ss:$28 sps:$4 sm:$0xff]  }
  0x4e   :  { %v3730_v32 = vld [vmem:[#allocation2 + $0x15c] ss:$28 sps:$4 sm:$0xff]   ;;  %v3747_v41 = vld [vmem:[#allocation2 + $0x14] ss:$28 sps:$4 sm:$0xff]  }
  0x4f   :  { %1255 = vmatmul.mubr.bf16.gmra.mrb[4].mxu0 %v3651_v30  ;;  %1351 = vmatmul.mubr.bf16.gmra.mrb[4].mxu1 %v3652_v31  ;;  %v3725_v30 = vld [vmem:[#allocation2 + $0x120] ss:$28 sps:$4 sm:$0xff]   ;;  %v3728_v31 = vld [vmem:[#allocation2 + $0x234] ss:$28 sps:$4 sm:$0xff]  }
  0x50   :  { %3174 = vmatpush3.bf16.msra.mxu1 %v3654_v33  ;;  %1262 = vmatprep.mubr.bf16.mxu0 %v3659_v35  ;;  %v3788_v33 = vld [vmem:[#allocation4 + $0x1b8] sm:$0xff]  }
  0x51   :  { %3175 = vmatprep.subr.bf16.mxu1 %v3655_v34  ;;  %1358 = vmatprep.mubr.bf16.mxu1 %v3661_v36  ;;  %v3732_v34 = vld [vmem:[#allocation2 + $0x230] ss:$28 sps:$4 sm:$0xff]   ;;  %v3733_v35 = vld [vmem:[#allocation2 + $0x158] ss:$28 sps:$4 sm:$0xff]  }
  0x52   :  { %3286 = vmatpush3.bf16.msra.mxu0 %v3678_v44  ;;  %v3737_v36 = vld [vmem:[#allocation2 + $0x26c] ss:$28 sps:$4 sm:$0xff]   ;;  %v3750_v44 = vld [vmem:[#allocation2 + $0x204] ss:$28 sps:$4 sm:$0xff]  }
  0x53   :  { %3287 = vmatprep.subr.bf16.mxu0 %v3688_v52  ;;  %v3763_v52 = vld [vmem:[#allocation2 + $0x274] ss:$28 sps:$4 sm:$0xff]  }
  0x54   :  { %3176 = vmatpush3.bf16.msra.mxu1 %v3657_v37  ;;  %v3739_v37 = vld [vmem:[#allocation2 + $0x194] ss:$28 sps:$4 sm:$0xff]  }
  0x55   :  { %3177 = vmatprep.subr.bf16.mxu1 %v3665_v38  ;;  %v3741_v38 = vld [vmem:[#allocation2 + $0x268] ss:$28 sps:$4 sm:$0xff]  }
  0x56   :  { %3288 = vmatpush3.bf16.msra.mxu0 %v3689_v53  ;;  %v3765_v53 = vld [vmem:[#allocation2 + $0xbc] ss:$28 sps:$4 sm:$0xff]  }
  0x57   :  { %1263 = vmatmul.mubr.bf16.gmra.mrb[8].mxu0 %v3663_v39  ;;  %1359 = vmatmul.mubr.bf16.gmra.mrb[8].mxu1 %v3664_v40  ;;  %v3742_v39 = vld [vmem:[#allocation2 + $0x190] ss:$28 sps:$4 sm:$0xff]  }
  0x58   :  { %3178 = vmatpush3.bf16.msra.mxu1 %v3666_v42  ;;  %1270 = vmatprep.mubr.bf16.mxu0 %v3669_v45  ;;  %v3743_v40 = vld [vmem:[#allocation2 + $0x1cc] ss:$28 sps:$4 sm:$0xff]  }
  0x59   :  { %3179 = vmatprep.subr.bf16.mxu1 %v3667_v43  ;;  %1366 = vmatprep.mubr.bf16.mxu1 %v3671_v46  ;;  %v3745_v42 = vld [vmem:[#allocation2 + $0x10] ss:$28 sps:$4 sm:$0xff]   ;;  %v3748_v43 = vld [vmem:[#allocation2 + $0x1c8] ss:$28 sps:$4 sm:$0xff]   ;;  %v3754_v46 = vld [vmem:[#allocation2 + $0x200] ss:$28 sps:$4 sm:$0xff]  }
  0x5a   :  { %3289 = vmatprep.subr.bf16.mxu0 %v3702_v60  ;;  %v3752_v45 = vld [vmem:[#allocation2 + $0x4c] ss:$28 sps:$4 sm:$0xff]   ;;  %v3776_v60 = vld [vmem:[#allocation2 + $0x2e4] ss:$28 sps:$4 sm:$0xff]  }
  0x5b   :  { %3290 = vmatpush3.bf16.msra.mxu0 %v3703_v61  ;;  %v3778_v61 = vld [vmem:[#allocation2 + $0x12c] ss:$28 sps:$4 sm:$0xff]  }
  0x5c   :  { %3180 = vmatpush3.bf16.msra.mxu1 %v3668_v47  ;;  %3291 = vmatprep.subr.bf16.mxu0 %v3711_v2  ;;  %v3755_v47 = vld [vmem:[#allocation2 + $0x48] ss:$28 sps:$4 sm:$0xff]   ;;  %v3786_v2 = vld [vmem:[#allocation2 + $0x318] ss:$28 sps:$4 sm:$0xff]  }
  0x5d   :  { %3181 = vmatprep.subr.bf16.mxu1 %v3675_v50  ;;  %v3760_v50 = vld [vmem:[#allocation2 + $0x238] ss:$28 sps:$4 sm:$0xff]  }
  0x5f   :  { %1271 = vmatmul.mubr.bf16.gmra.mrb[12].mxu0 %v3673_v48  ;;  %1367 = vmatmul.mubr.bf16.gmra.mrb[12].mxu1 %v3674_v49  ;;  %v3756_v48 = vld [vmem:[#allocation2 + $0x23c] ss:$28 sps:$4 sm:$0xff]   ;;  %v3758_v49 = vld [vmem:[#allocation2 + $0x84] ss:$28 sps:$4 sm:$0xff]  }
  0x60   :  { %3182 = vmatpush3.bf16.msra.mxu1 %v3677_v51  ;;  %1278 = vmatprep.mubr.bf16.mxu0 %v3681_v54  ;;  %v3761_v51 = vld [vmem:[#allocation2 + $0x80] ss:$28 sps:$4 sm:$0xff]   ;;  %v3767_v54 = vld [vmem:[#allocation2 + $0x270] ss:$28 sps:$4 sm:$0xff]  }
  0x61   :  { %3183 = vmatprep.subr.bf16.mxu1 %v3679_v55  ;;  %1407 = vmatprep.mubr.bf16.mxu1 %v3685_v56  ;;  %v3768_v55 = vld [vmem:[#allocation2 + $0xb8] ss:$28 sps:$4 sm:$0xff]   ;;  %v3769_v56 = vld [vmem:[#allocation2 + $0x2ac] ss:$28 sps:$4 sm:$0xff]  }
  0x62   :  { %3292 = vmatpush3.bf16.msra.mxu0 %v3712_v3  ;;  %v3787_v3 = vld [vmem:[#allocation2 + $0x160] ss:$28 sps:$4 sm:$0xff]  }
  0x63   :  { %3293 = vmatprep.subr.bf16.mxu0 %v3726_v9  ;;  %v3797_v9 = vld [vmem:[#allocation2 + $0x18] ss:$28 sps:$4 sm:$0xff]  }
  0x64   :  { %3184 = vmatpush3.bf16.msra.mxu1 %v3680_v57  ;;  %v3771_v57 = vld [vmem:[#allocation2 + $0xf4] ss:$28 sps:$4 sm:$0xff]  }
  0x65   :  { %3461 = vmatprep.subr.bf16.mxu1 %v3687_v58 }
  0x66   :  { %3294 = vmatpush3.bf16.msra.mxu0 %v3727_v10  ;;  %v3798_v10 = vld [vmem:[#allocation2 + $0x1d0] ss:$28 sps:$4 sm:$0xff]  }
  0x67   :  { %1279 = vmatmul.mubr.bf16.gmra.mrb[16].mxu0 %v3686_v62  ;;  %1408 = vmatmul.mubr.bf16.vlgmr.msra.gmra.mrb[16].mxu1 %v3683_v59  ;;  %v3774_v59 = vld [vmem:[#allocation2 + $0xf0] ss:$28 sps:$4 sm:$0xff]   ;;  %v3780_v62 = vld [vmem:[#allocation2 + $0x2e0] ss:$28 sps:$4 sm:$0xff]  }
  0x68   :  { %3462 = vmatpush3.bf16.msra.mxu1 %v3687_v58  ;;  %1286 = vmatprep.mubr.bf16.mxu0 %v3690_v63  ;;  %v3773_v58 = vld [vmem:[#allocation2 + $0x2a8] ss:$28 sps:$4 sm:$0xff]  }
  0x69   :  { %1415 = vmatprep.mubr.bf16.mxu1 %v3692_v0  ;;  %3463 = vmatprep.subr.bf16.mxu1 %v3704_v1  ;;  %v3781_v63 = vld [vmem:[#allocation2 + $0x128] ss:$28 sps:$4 sm:$0xff]   ;;  %v3782_v0 = vld [vmem:[#allocation2 + $0x31c] ss:$28 sps:$4 sm:$0xff]  }
  0x6a   :  { %3295 = vmatprep.subr.bf16.mxu0 %v3735_v16  ;;  %v3805_v16 = vld [vmem:[#allocation2 + $0x244] ss:$28 sps:$4 sm:$0xff]  }
  0x6b   :  { %3296 = vmatpush3.bf16.msra.mxu0 %v3736_v17  ;;  %v3807_v17 = vld [vmem:[#allocation2 + $0xf8] ss:$28 sps:$4 sm:$0xff]  }
  0x6c   :  { %3464 = vmatpush3.bf16.msra.mxu1 %v3704_v1  ;;  %v3784_v1 = vld [vmem:[#allocation2 + $0x164] ss:$28 sps:$4 sm:$0xff]  }
  0x6d   :  { %3465 = vmatprep.subr.bf16.mxu1 %v3719_v7 }
  0x6f   :  { %1287 = vmatmul.mubr.bf16.gmra.mrb[20].mxu0 %v3694_v4  ;;  %1416 = vmatmul.mubr.bf16.gmra.mrb[20].mxu1 %v3695_v5  ;;  %v3789_v4 = vld [vmem:[#allocation2 + $0x354] ss:$28 sps:$4 sm:$0xff]   ;;  %v3791_v5 = vld [vmem:[#allocation2 + $0x19c] ss:$28 sps:$4 sm:$0xff]  }
  0x70   :  { %1294 = vmatprep.mubr.bf16.mxu0 %v3696_v6  ;;  %1423 = vmatprep.mubr.bf16.mxu1 %v3698_v8  ;;  %v3793_v6 = vld [vmem:[#allocation2 + $0x350] ss:$28 sps:$4 sm:$0xff]  }
  0x71   :  { %3466 = vmatpush3.bf16.msra.mxu1 %v3719_v7  ;;  %v3794_v7 = vld [vmem:[#allocation2 + $0x198] ss:$28 sps:$4 sm:$0xff]  }
  0x72   :  { %3467 = vmatprep.subr.bf16.mxu1 %v3734_v15  ;;  %v3795_v8 = vld [vmem:[#allocation2 + $0x1d4] ss:$28 sps:$4 sm:$0xff]  }
  0x75   :  { %3468 = vmatpush3.bf16.msra.mxu1 %v3734_v15  ;;  %v3804_v15 = vld [vmem:[#allocation2 + $0xc0] ss:$28 sps:$4 sm:$0xff]  }
  0x76   :  { %3469 = vmatprep.subr.bf16.mxu1 %v3749_v22 }
  0x77   :  { %1295 = vmatmul.mubr.bf16.gmra.mrb[24].mxu0 %v3700_v11  ;;  %1424 = vmatmul.mubr.bf16.gmra.mrb[24].mxu1 %v3701_v12  ;;  %v3799_v11 = vld [vmem:[#allocation2 + $0x50] ss:$28 sps:$4 sm:$0xff]  }
  0x78   :  { %1302 = vmatprep.mubr.bf16.mxu0 %v3705_v13  ;;  %1431 = vmatprep.mubr.bf16.mxu1 %v3707_v14  ;;  %v3800_v12 = vld [vmem:[#allocation2 + $0x20c] ss:$28 sps:$4 sm:$0xff]  }
  0x79   :  { %3470 = vmatpush3.bf16.msra.mxu1 %v3749_v22  ;;  %v3802_v13 = vld [vmem:[#allocation2 + $0x88] ss:$28 sps:$4 sm:$0xff]   ;;  %v3813_v22 = vld [vmem:[#allocation2 + $0x278] ss:$28 sps:$4 sm:$0xff]  }
  0x7a   :  { %3471 = vmatprep.subr.bf16.mxu1 %v3762_v25  ;;  %v3803_v14 = vld [vmem:[#allocation2 + $0x208] ss:$28 sps:$4 sm:$0xff]  }
  0x7d   :  { %3472 = vmatpush3.bf16.msra.mxu1 %v3762_v25  ;;  %v3817_v25 = vld [vmem:[#allocation2 + $0x1d8] ss:$28 sps:$4 sm:$0xff]  }
  0x7e   :  { %3473 = vmatprep.subr.bf16.mxu1 %v3775_v28 }
  0x7f   :  { %1303 = vmatmul.mubr.bf16.gmra.mrb[28].mxu0 %v3709_v18  ;;  %1432 = vmatmul.mubr.bf16.gmra.mrb[28].mxu1 %v3710_v19  ;;  %v3808_v18 = vld [vmem:[#allocation2 + $0x240] ss:$28 sps:$4 sm:$0xff]   ;;  %v3809_v19 = vld [vmem:[#allocation2 + $0x130] ss:$28 sps:$4 sm:$0xff]  }
  0x80   :  { %1310 = vmatprep.mubr.bf16.mxu0 %v3713_v20  ;;  %1439 = vmatprep.mubr.bf16.mxu1 %v3715_v21  ;;  %v3810_v20 = vld [vmem:[#allocation2 + $0x27c] ss:$28 sps:$4 sm:$0xff]   ;;  %v3812_v21 = vld [vmem:[#allocation2 + $0x168] ss:$28 sps:$4 sm:$0xff]  }
  0x81   :  { %3474 = vmatpush3.bf16.msra.mxu1 %v3775_v28  ;;  %v3820_v28 = vld [vmem:[#allocation2 + $0x2ec] ss:$28 sps:$4 sm:$0xff]  }
  0x82   :  { %3475 = vmatprep.subr.bf16.mxu1 %v3788_v33 }
  0x85   :  { %3476 = vmatpush3.bf16.msra.mxu1 %v3788_v33  ;;  %v3825_v33 = vld [vmem:[#allocation2 + $0x324] ss:$28 sps:$4 sm:$0xff]  }
  0x87   :  { %1311 = vmatmul.mubr.bf16.gmra.mrb[32].mxu0 %v3717_v23  ;;  %1440 = vmatmul.mubr.bf16.gmra.mrb[32].mxu1 %v3718_v24  ;;  %v3814_v23 = vld [vmem:[#allocation2 + $0x1a0] ss:$28 sps:$4 sm:$0xff]   ;;  %v3815_v24 = vld [vmem:[#allocation2 + $0x2b4] ss:$28 sps:$4 sm:$0xff]  }
  0x88   :  { %1318 = vmatprep.mubr.bf16.mxu0 %v3720_v26  ;;  %1447 = vmatprep.mubr.bf16.mxu1 %v3722_v27  ;;  %v3818_v26 = vld [vmem:[#allocation2 + $0x2b0] ss:$28 sps:$4 sm:$0xff]  }
  0x89   :  { %v3819_v27 = vld [vmem:[#allocation2 + $0x210] ss:$28 sps:$4 sm:$0xff]  }
  0x8f   :  { %1319 = vmatmul.mubr.bf16.gmra.mrb[36].mxu0 %v3724_v29  ;;  %1448 = vmatmul.mubr.bf16.gmra.mrb[36].mxu1 %v3725_v30  ;;  %v3822_v29 = vld [vmem:[#allocation2 + $0x248] ss:$28 sps:$4 sm:$0xff]  }
  0x90   :  { %1326 = vmatprep.mubr.bf16.mxu0 %v3728_v31  ;;  %1455 = vmatprep.mubr.bf16.mxu1 %v3730_v32  ;;  %v3835_v30 = vld [vmem:[%s4944_s3] sm:$0xff]  }
  0x91   :  { %3509 = vmatprep.subr.bf16.mxu1 %v3835_v30  ;;  %v3823_v31 = vld [vmem:[#allocation2 + $0x2e8] ss:$28 sps:$4 sm:$0xff]   ;;  %v3824_v32 = vld [vmem:[#allocation2 + $0x280] ss:$28 sps:$4 sm:$0xff]  }
  0x97   :  { %1327 = vmatmul.mubr.bf16.gmra.mrb[40].mxu0 %v3732_v34  ;;  %1456 = vmatmul.mubr.bf16.gmra.mrb[40].mxu1 %v3733_v35  ;;  %v3827_v34 = vld [vmem:[#allocation2 + $0x2b8] ss:$28 sps:$4 sm:$0xff]   ;;  %v3836_v35 = vld [vmem:[%s4944_s3 + $0x8] sm:$0xff]  }
  0x98   :  { %1334 = vmatprep.mubr.bf16.mxu0 %v3737_v36  ;;  %1463 = vmatprep.mubr.bf16.mxu1 %v3739_v37  ;;  %v3828_v36 = vld [vmem:[#allocation2 + $0x320] ss:$28 sps:$4 sm:$0xff]   ;;  %v3829_v37 = vld [vmem:[#allocation2 + $0x2f0] ss:$28 sps:$4 sm:$0xff]  }
  0x9f   :  { %1335 = vmatmul.mubr.bf16.gmra.mrb[44].mxu0 %v3741_v38  ;;  %1464 = vmatmul.mubr.bf16.gmra.mrb[44].mxu1 %v3742_v39  ;;  %v3830_v38 = vld [vmem:[#allocation2 + $0x35c] ss:$28 sps:$4 sm:$0xff]   ;;  %v3832_v39 = vld [vmem:[#allocation2 + $0x328] ss:$28 sps:$4 sm:$0xff]  }
  0xa0   :  { %1471 = vmatprep.mubr.bf16.mxu1 %v3743_v40  ;;  %1568 = vmatprep.mubr.bf16.mxu0 %v3747_v41  ;;  %v3837_v40 = vld [vmem:[%s4944_s3 + $0x10] sm:$0xff]  }
  0xa7   :  { %1472 = vmatmul.mubr.bf16.gmra.mrb[48].mxu1 %v3748_v43  ;;  %1569 = vmatmul.mubr.bf16.vlgmr.msra.gmra.mrb[48].mxu0 %v3745_v42 }
  0xa8   :  { %1479 = vmatprep.mubr.bf16.mxu1 %v3750_v44  ;;  %1576 = vmatprep.mubr.bf16.mxu0 %v3752_v45  ;;  %v3833_v45 = vld [vmem:[#allocation2 + $0x358] ss:$28 sps:$4 sm:$0xff]  }
  0xaf   :  { %1480 = vmatmul.mubr.bf16.gmra.mrb[52].mxu1 %v3754_v46  ;;  %1577 = vmatmul.mubr.bf16.gmra.mrb[52].mxu0 %v3755_v47  ;;  %v3834_v46 = vld [vmem:[#allocation2 + $0x360] ss:$28 sps:$4 sm:$0xff]  }
  0xb0   :  { %1487 = vmatprep.mubr.bf16.mxu1 %v3756_v48  ;;  %1584 = vmatprep.mubr.bf16.mxu0 %v3758_v49 }
  0xb7   :  { %1488 = vmatmul.mubr.bf16.gmra.mrb[56].mxu1 %v3760_v50  ;;  %1585 = vmatmul.mubr.bf16.gmra.mrb[56].mxu0 %v3761_v51 }
  0xb8   :  { %1495 = vmatprep.mubr.bf16.mxu1 %v3763_v52  ;;  %1592 = vmatprep.mubr.bf16.mxu0 %v3765_v53 }
  0xbf   :  { %1496 = vmatmul.mubr.bf16.gmra.mrb[60].mxu1 %v3767_v54  ;;  %1593 = vmatmul.mubr.bf16.gmra.mrb[60].mxu0 %v3768_v55  ;;  %v3838_v55 = vld [vmem:[%s4944_s3 + $0x18] sm:$0xff]  }
  0xc0   :  { %1503 = vmatprep.mubr.bf16.mxu1 %v3769_v56  ;;  %1600 = vmatprep.mubr.bf16.mxu0 %v3771_v57 }
  0xc7   :  { %1504 = vmatmul.mubr.bf16.gmra.mrb[64].mxu1 %v3773_v58  ;;  %1601 = vmatmul.mubr.bf16.gmra.mrb[64].mxu0 %v3774_v59 }
  0xc8   :  { %1511 = vmatprep.mubr.bf16.mxu1 %v3776_v60  ;;  %1608 = vmatprep.mubr.bf16.mxu0 %v3778_v61 }
  0xcf   :  { %1512 = vmatmul.mubr.bf16.gmra.mrb[68].mxu1 %v3780_v62  ;;  %1609 = vmatmul.mubr.bf16.gmra.mrb[68].mxu0 %v3781_v63 }
  0xd0   :  { %1519 = vmatprep.mubr.bf16.mxu1 %v3782_v0  ;;  %1616 = vmatprep.mubr.bf16.mxu0 %v3784_v1 }
  0xd7   :  { %1520 = vmatmul.mubr.bf16.gmra.mrb[72].mxu1 %v3786_v2  ;;  %1617 = vmatmul.mubr.bf16.gmra.mrb[72].mxu0 %v3787_v3 }
  0xd8   :  { %1527 = vmatprep.mubr.bf16.mxu1 %v3789_v4  ;;  %1624 = vmatprep.mubr.bf16.mxu0 %v3791_v5  ;;  %v3839_v4 = vld [vmem:[%s4944_s3 + $0x20] sm:$0xff]  }
  0xdf   :  { %1528 = vmatmul.mubr.bf16.gmra.mrb[76].mxu1 %v3793_v6  ;;  %1625 = vmatmul.mubr.bf16.gmra.mrb[76].mxu0 %v3794_v7 }
  0xe0   :  { %1632 = vmatprep.mubr.bf16.mxu0 %v3795_v8  ;;  %3477 = vmatprep.mubr.bf16.mxu1 %v3797_v9 }
  0xe7   :  { %1633 = vmatmul.mubr.bf16.gmra.mrb[80].mxu0 %v3798_v10  ;;  %3478 = vmatmul.mubr.bf16.vlgmr.msra.gmra.mrb[80].mxu1 %v3799_v11 }
  0xe8   :  { %1640 = vmatprep.mubr.bf16.mxu0 %v3800_v12  ;;  %3481 = vmatprep.mubr.bf16.mxu1 %v3802_v13 }
  0xe9   :  { %3510 = vmatpush3.bf16.msra.mxu1 %v3835_v30  ;;  %v3841_v30 = vld [vmem:[%s4944_s3 + $0x30] sm:$0xff]  }
  0xea   :  { %3511 = vmatprep.subr.bf16.mxu1 %v3836_v35 }
  0xed   :  { %3512 = vmatpush3.bf16.msra.mxu1 %v3836_v35 }
  0xee   :  { %3513 = vmatprep.subr.bf16.mxu1 %v3837_v40 }
  0xef   :  { %1641 = vmatmul.mubr.bf16.gmra.mrb[84].mxu0 %v3803_v14  ;;  %3482 = vmatmul.mubr.bf16.gmra.mrb[84].mxu1 %v3804_v15 }
  0xf0   :  { %1648 = vmatprep.mubr.bf16.mxu0 %v3805_v16  ;;  %3485 = vmatprep.mubr.bf16.mxu1 %v3807_v17  ;;  %v3840_v17 = vld [vmem:[%s4944_s3 + $0x28] sm:$0xff]  }
  0xf1   :  { %3514 = vmatpush3.bf16.msra.mxu1 %v3837_v40 }
  0xf2   :  { %3515 = vmatprep.subr.bf16.mxu1 %v3838_v55 }
  0xf5   :  { %3516 = vmatpush3.bf16.msra.mxu1 %v3838_v55 }
  0xf6   :  { %3517 = vmatprep.subr.bf16.mxu1 %v3839_v4 }
  0xf7   :  { %1649 = vmatmul.mubr.bf16.gmra.mrb[88].mxu0 %v3808_v18  ;;  %3486 = vmatmul.mubr.bf16.gmra.mrb[88].mxu1 %v3809_v19 }
  0xf8   :  { %1656 = vmatprep.mubr.bf16.mxu0 %v3810_v20  ;;  %3489 = vmatprep.mubr.bf16.mxu1 %v3812_v21 }
  0xf9   :  { %3518 = vmatpush3.bf16.msra.mxu1 %v3839_v4 }
  0xfa   :  { %3519 = vmatprep.subr.bf16.mxu1 %v3840_v17 }
  0xfd   :  { %3520 = vmatpush3.bf16.msra.mxu1 %v3840_v17 }
  0xfe   :  { %3521 = vmatprep.subr.bf16.mxu1 %v3841_v30 }
  0xff   :  { %1657 = vmatmul.mubr.bf16.gmra.mrb[92].mxu0 %v3813_v22  ;;  %3490 = vmatmul.mubr.bf16.gmra.mrb[92].mxu1 %v3814_v23 }
 0x100   :  { %1664 = vmatprep.mubr.bf16.mxu0 %v3815_v24  ;;  %3493 = vmatprep.mubr.bf16.mxu1 %v3817_v25 }
 0x101   :  { %3522 = vmatpush3.bf16.msra.mxu1 %v3841_v30 }
 0x107   :  { %1665 = vmatmul.mubr.bf16.gmra.mrb[96].mxu0 %v3818_v26  ;;  %3494 = vmatmul.mubr.bf16.gmra.mrb[96].mxu1 %v3819_v27 }
 0x108   :  { %1672 = vmatprep.mubr.bf16.mxu0 %v3820_v28  ;;  %3497 = vmatprep.mubr.bf16.mxu1 %v3822_v29 }
 0x10f   :  { %1673 = vmatmul.mubr.bf16.gmra.mrb[100].mxu0 %v3823_v31  ;;  %3498 = vmatmul.mubr.bf16.gmra.mrb[100].mxu1 %v3824_v32  ;;  %v4149_v31 = vld [vmem:[%s4943_s2] ss:$0 sm:$0xff] }
 0x110   :  { %1680 = vmatprep.mubr.bf16.mxu0 %v3825_v33  ;;  %3501 = vmatprep.mubr.bf16.mxu1 %v3827_v34 }
 0x117   :  { %1681 = vmatmul.mubr.bf16.gmra.mrb[104].mxu0 %v3828_v36  ;;  %3502 = vmatmul.mubr.bf16.gmra.mrb[104].mxu1 %v3829_v37 }
 0x118   :  { %1688 = vmatprep.mubr.bf16.mxu0 %v3830_v38  ;;  %3505 = vmatprep.mubr.bf16.mxu1 %v3832_v39 }
 0x11a   :  { %v3073_v41 = vpop.f32.mrb[0].mxu0  ;;  %v3145_v42 = vpop.f32.mrb[0].mxu1 }
 0x11b   :  { %v3074_v43 = vpop.f32.mrb[1].mxu0  ;;  %v3146_v44 = vpop.f32.mrb[1].mxu1 }
 0x11c   :  { %v4102_v47 = vadd.f32 %v3074_v43, %v3073_v41  ;;  %v4104_v48 = vadd.f32 %v3146_v44, %v3145_v42  ;;  %v3076_v49 = vpop.f32.mrb[2].mxu0  ;;  %v3148_v50 = vpop.f32.mrb[2].mxu1 }
 0x11d   :  { %v3077_v51 = vpop.f32.mrb[3].mxu0  ;;  %v3149_v52 = vpop.f32.mrb[3].mxu1 }
 0x11e   :  { %v4106_v53 = vadd.f32 %v3077_v51, %v3076_v49  ;;  %v4108_v54 = vadd.f32 %v3149_v52, %v3148_v50  ;;  %v1249_v36 = vadd.f32 %v4102_v47, %v4149_v31  ;;  %v3842_v49 = vld [vmem:[%s4944_s3 + $0x38] sm:$0xff]  }
 0x11f   :  { %1689 = vmatmul.mubr.bf16.gmra.mrb[108].mxu0 %v3833_v45  ;;  %3506 = vmatmul.mubr.bf16.gmra.mrb[108].mxu1 %v3834_v46 }
 0x120   :  { %v1252_v43 = vadd.f32 %v4106_v53, %v4149_v31  ;;  %3523 = vmatprep.subr.bf16.mxu1 %v3842_v49 }
 0x121   :  { %3524 = vmatpush3.bf16.msra.mxu1 %v3842_v49 }
 0x122   :  { %v3079_v56 = vpop.f32.mrb[4].mxu0  ;;  %v3151_v57 = vpop.f32.mrb[4].mxu1 }
 0x123   :  { %v3080_v58 = vpop.f32.mrb[5].mxu0  ;;  %v3152_v59 = vpop.f32.mrb[5].mxu1 }
 0x124   :  { %v4113_v60 = vadd.f32 %v3080_v58, %v3079_v56  ;;  %v4115_v61 = vadd.f32 %v3152_v59, %v3151_v57  ;;  %v3082_v62 = vpop.f32.mrb[6].mxu0  ;;  %v3154_v63 = vpop.f32.mrb[6].mxu1 }
 0x125   :  { %v3083_v0 = vpop.f32.mrb[7].mxu0  ;;  %v3155_v1 = vpop.f32.mrb[7].mxu1 }
 0x126   :  { %v4117_v2 = vadd.f32 %v3083_v0, %v3082_v62  ;;  %v4119_v3 = vadd.f32 %v3155_v1, %v3154_v63  ;;  %v1257_v53 = vadd.f32 %v4113_v60, %v4149_v31 }
 0x128   :  { %v1260_v0 = vadd.f32 %v4117_v2, %v4149_v31 }
 0x12a   :  { %v3085_v5 = vpop.f32.mrb[8].mxu0  ;;  %v3157_v6 = vpop.f32.mrb[8].mxu1 }
 0x12b   :  { %v3086_v7 = vpop.f32.mrb[9].mxu0  ;;  %v3158_v8 = vpop.f32.mrb[9].mxu1 }
 0x12c   :  { %v4124_v9 = vadd.f32 %v3086_v7, %v3085_v5  ;;  %v4126_v10 = vadd.f32 %v3158_v8, %v3157_v6  ;;  %v3088_v11 = vpop.f32.mrb[10].mxu0  ;;  %v3160_v12 = vpop.f32.mrb[10].mxu1 }
 0x12d   :  { %v3089_v13 = vpop.f32.mrb[11].mxu0  ;;  %v3161_v14 = vpop.f32.mrb[11].mxu1 }
 0x12e   :  { %v4128_v15 = vadd.f32 %v3089_v13, %v3088_v11  ;;  %v4130_v16 = vadd.f32 %v3161_v14, %v3160_v12  ;;  %v1265_v12 = vadd.f32 %v4124_v9, %v4149_v31 }
 0x132   :  { %v3091_v18 = vpop.f32.mrb[12].mxu0  ;;  %v3163_v19 = vpop.f32.mrb[12].mxu1 }
 0x133   :  { %v3092_v20 = vpop.f32.mrb[13].mxu0  ;;  %v3164_v21 = vpop.f32.mrb[13].mxu1 }
 0x134   :  { %v4135_v22 = vadd.f32 %v3092_v20, %v3091_v18  ;;  %v4137_v23 = vadd.f32 %v3164_v21, %v3163_v19  ;;  %v3094_v24 = vpop.f32.mrb[14].mxu0  ;;  %v3166_v25 = vpop.f32.mrb[14].mxu1  ;;  %v1268_v20 = vadd.f32 %v4128_v15, %v4149_v31 }
 0x135   :  { %v3095_v26 = vpop.f32.mrb[15].mxu0  ;;  %v3167_v27 = vpop.f32.mrb[15].mxu1 }
 0x136   :  { %v4139_v28 = vadd.f32 %v3095_v26, %v3094_v24  ;;  %v4141_v29 = vadd.f32 %v3167_v27, %v3166_v25 }
 0x13a   :  { %v3097_v32 = vpop.f32.mrb[16].mxu0  ;;  %v3185_v33 = vpop.f32.mrb[16].mxu1 }
 0x13b   :  { %v3098_v34 = vpop.f32.mrb[17].mxu0  ;;  %v3186_v35 = vpop.f32.mrb[17].mxu1 }
 0x13c   :  { %v4153_v37 = vadd.f32 %v3098_v34, %v3097_v32  ;;  %v3187_v38 = vadd.f32 %v3186_v35, %v3185_v33  ;;  %v3100_v39 = vpop.f32.mrb[18].mxu0  ;;  %v3188_v40 = vpop.f32.mrb[18].mxu1  ;;  %v1273_v33 = vadd.f32 %v4135_v22, %v4149_v31 }
 0x13d   :  { %v3101_v41 = vpop.f32.mrb[19].mxu0  ;;  %v3189_v42 = vpop.f32.mrb[19].mxu1 }
 0x13e   :  { %v4157_v44 = vadd.f32 %v3187_v38, %v1249_v36  ;;  %v4159_v45 = vadd.f32 %v3101_v41, %v3100_v39  ;;  %v3190_v46 = vadd.f32 %v3189_v42, %v3188_v40  ;;  %v1276_v40 = vadd.f32 %v4139_v28, %v4149_v31 }
 0x140   :  { %v4164_v47 = vadd.f32 %v3190_v46, %v1252_v43 }
 0x142   :  { %v3103_v50 = vpop.f32.mrb[20].mxu0  ;;  %v3191_v51 = vpop.f32.mrb[20].mxu1 }
 0x143   :  { %v3104_v52 = vpop.f32.mrb[21].mxu0  ;;  %v3192_v55 = vpop.f32.mrb[21].mxu1 }
 0x144   :  { %v4168_v56 = vadd.f32 %v3104_v52, %v3103_v50  ;;  %v3193_v57 = vadd.f32 %v3192_v55, %v3191_v51  ;;  %v3106_v58 = vpop.f32.mrb[22].mxu0  ;;  %v3194_v59 = vpop.f32.mrb[22].mxu1  ;;  %v1281_v52 = vadd.f32 %v4153_v37, %v4149_v31 }
 0x145   :  { %v3107_v62 = vpop.f32.mrb[23].mxu0  ;;  %v3195_v63 = vpop.f32.mrb[23].mxu1 }
 0x146   :  { %v4172_v1 = vadd.f32 %v3193_v57, %v1257_v53  ;;  %v3108_v4 = vadd.f32 %v3107_v62, %v3106_v58  ;;  %v3196_v5 = vadd.f32 %v3195_v63, %v3194_v59  ;;  %v1284_v62 = vadd.f32 %v4159_v45, %v4149_v31 }
 0x148   :  { %v4174_v6 = vadd.f32 %v3196_v5, %v1260_v0 }
 0x14a   :  { %v3109_v7 = vpop.f32.mrb[24].mxu0  ;;  %v3197_v8 = vpop.f32.mrb[24].mxu1 }
 0x14b   :  { %v3110_v11 = vpop.f32.mrb[25].mxu0  ;;  %v3198_v60 = vpop.f32.mrb[25].mxu1 }
 0x14c   :  { %v4178_v13 = vadd.f32 %v3110_v11, %v3109_v7  ;;  %v3199_v14 = vadd.f32 %v3198_v60, %v3197_v8  ;;  %v3112_v17 = vpop.f32.mrb[26].mxu0  ;;  %v3200_v18 = vpop.f32.mrb[26].mxu1 }
 0x14d   :  { %v3113_v19 = vpop.f32.mrb[27].mxu0  ;;  %v3201_v2 = vpop.f32.mrb[27].mxu1 }
 0x14e   :  { %v4182_v21 = vadd.f32 %v3199_v14, %v1265_v12  ;;  %v3114_v24 = vadd.f32 %v3113_v19, %v3112_v17  ;;  %v3202_v25 = vadd.f32 %v3201_v2, %v3200_v18  ;;  %v1289_v12 = vadd.f32 %v4168_v56, %v4149_v31 }
 0x150   :  { %v4184_v26 = vadd.f32 %v3202_v25, %v1268_v20  ;;  %v1292_v20 = vadd.f32 %v3108_v4, %v4149_v31 }
 0x152   :  { %v3115_v27 = vpop.f32.mrb[28].mxu0  ;;  %v3203_v30 = vpop.f32.mrb[28].mxu1 }
 0x153   :  { %v3116_v32 = vpop.f32.mrb[29].mxu0  ;;  %v3204_v9 = vpop.f32.mrb[29].mxu1 }
 0x154   :  { %v4188_v34 = vadd.f32 %v3116_v32, %v3115_v27  ;;  %v3205_v35 = vadd.f32 %v3204_v9, %v3203_v30  ;;  %v3118_v36 = vpop.f32.mrb[30].mxu0  ;;  %v3206_v38 = vpop.f32.mrb[30].mxu1 }
 0x155   :  { %v3119_v39 = vpop.f32.mrb[31].mxu0  ;;  %v3207_v15 = vpop.f32.mrb[31].mxu1 }
 0x156   :  { %v4192_v41 = vadd.f32 %v3205_v35, %v1273_v33  ;;  %v3120_v42 = vadd.f32 %v3119_v39, %v3118_v36  ;;  %v3208_v43 = vadd.f32 %v3207_v15, %v3206_v38  ;;  %v1297_v36 = vadd.f32 %v4178_v13, %v4149_v31 }
 0x158   :  { %v4194_v46 = vadd.f32 %v3208_v43, %v1276_v40 }
 0x15a   :  { %v3121_v49 = vpop.f32.mrb[32].mxu0  ;;  %v3209_v50 = vpop.f32.mrb[32].mxu1 }
 0x15b   :  { %v3122_v51 = vpop.f32.mrb[33].mxu0  ;;  %v3210_v22 = vpop.f32.mrb[33].mxu1 }
 0x15c   :  { %v4198_v55 = vadd.f32 %v3122_v51, %v3121_v49  ;;  %v3211_v53 = vadd.f32 %v3210_v22, %v3209_v50  ;;  %v3124_v57 = vpop.f32.mrb[34].mxu0  ;;  %v3212_v58 = vpop.f32.mrb[34].mxu1  ;;  %v1300_v49 = vadd.f32 %v3114_v24, %v4149_v31 }
 0x15d   :  { %v3125_v59 = vpop.f32.mrb[35].mxu0  ;;  %v3213_v28 = vpop.f32.mrb[35].mxu1 }
 0x15e   :  { %v4202_v63 = vadd.f32 %v3211_v53, %v1281_v52  ;;  %v3126_v0 = vadd.f32 %v3125_v59, %v3124_v57  ;;  %v3214_v5 = vadd.f32 %v3213_v28, %v3212_v58  ;;  %v1305_v59 = vadd.f32 %v4188_v34, %v4149_v31 }
 0x160   :  { %v4204_v7 = vadd.f32 %v3214_v5, %v1284_v62 }
 0x162   :  { %v3127_v8 = vpop.f32.mrb[36].mxu0  ;;  %v3215_v11 = vpop.f32.mrb[36].mxu1 }
 0x163   :  { %v3128_v60 = vpop.f32.mrb[37].mxu0  ;;  %v3216_v37 = vpop.f32.mrb[37].mxu1 }
 0x164   :  { %v4208_v14 = vadd.f32 %v3128_v60, %v3127_v8  ;;  %v3217_v17 = vadd.f32 %v3216_v37, %v3215_v11  ;;  %v3130_v18 = vpop.f32.mrb[38].mxu0  ;;  %v3218_v19 = vpop.f32.mrb[38].mxu1  ;;  %v1308_v60 = vadd.f32 %v3120_v42, %v4149_v31  ;;  %v1316_v42 = vadd.f32 %v3126_v0, %v4149_v31  ;;  %v3844_v0 = vld [vmem:[%s4946_s5 + $0x8] sm:$0xff]  }
 0x165   :  { %v3131_v2 = vpop.f32.mrb[39].mxu0  ;;  %v3219_v45 = vpop.f32.mrb[39].mxu1 }
 0x166   :  { %v4211_v25 = vadd.f32 %v3217_v17, %v1289_v12  ;;  %v4213_v27 = vadd.f32 %v3131_v2, %v3130_v18  ;;  %v3220_v30 = vadd.f32 %v3219_v45, %v3218_v19 }
 0x168   :  { %v4215_v32 = vadd.f32 %v3220_v30, %v1292_v20  ;;  %v1313_v20 = vadd.f32 %v4198_v55, %v4149_v31  ;;  %v3843_v55 = vld [vmem:[%s4946_s5] sm:$0xff]  }
 0x169   :  { %3557 = vmatprep.subr.bf16.mxu0 %v3843_v55 }
 0x16a   :  { %v3133_v9 = vpop.f32.mrb[40].mxu0  ;;  %v3221_v33 = vpop.f32.mrb[40].mxu1  ;;  %3558 = vmatpush3.bf16.msra.mxu0 %v3843_v55 }
 0x16b   :  { %v3134_v35 = vpop.f32.mrb[41].mxu0  ;;  %v3222_v56 = vpop.f32.mrb[41].mxu1  ;;  %3559 = vmatprep.subr.bf16.mxu0 %v3844_v0 }
 0x16c   :  { %v4219_v38 = vadd.f32 %v3134_v35, %v3133_v9  ;;  %v3223_v39 = vadd.f32 %v3222_v56, %v3221_v33  ;;  %v3136_v15 = vpop.f32.mrb[42].mxu0  ;;  %v3224_v40 = vpop.f32.mrb[42].mxu1 }
 0x16d   :  { %v3137_v4 = vpop.f32.mrb[43].mxu0  ;;  %v3225_v43 = vpop.f32.mrb[43].mxu1 }
 0x16e   :  { %v4222_v50 = vadd.f32 %v3223_v39, %v1297_v36  ;;  %v4224_v51 = vadd.f32 %v3137_v4, %v3136_v15  ;;  %v3226_v22 = vadd.f32 %v3225_v43, %v3224_v40  ;;  %3560 = vmatpush3.bf16.msra.mxu0 %v3844_v0 }
 0x170   :  { %v4226_v52 = vadd.f32 %v3226_v22, %v1300_v49 }
 0x172   :  { %v3139_v53 = vpop.f32.mrb[44].mxu0  ;;  %v3227_v57 = vpop.f32.mrb[44].mxu1 }
 0x173   :  { %v3140_v58 = vpop.f32.mrb[45].mxu0  ;;  %v3228_v13 = vpop.f32.mrb[45].mxu1 }
 0x174   :  { %v4230_v28 = vadd.f32 %v3140_v58, %v3139_v53  ;;  %v3229_v62 = vadd.f32 %v3228_v13, %v3227_v57  ;;  %v3142_v5 = vpop.f32.mrb[46].mxu0  ;;  %v3230_v8 = vpop.f32.mrb[46].mxu1 }
 0x175   :  { %v3143_v24 = vpop.f32.mrb[47].mxu0  ;;  %v3231_v11 = vpop.f32.mrb[47].mxu1 }
 0x176   :  { %v4233_v37 = vadd.f32 %v3229_v62, %v1305_v59  ;;  %v4235_v12 = vadd.f32 %v3143_v24, %v3142_v5  ;;  %v3232_v17 = vadd.f32 %v3231_v11, %v3230_v8  ;;  %v3845_v5 = vld [vmem:[%s4946_s5 + $0x10] sm:$0xff]   ;;  %v1324_v8 = vadd.f32 %v4213_v27, %v4149_v31  ;;  %v3846_v27 = vld [vmem:[%s4946_s5 + $0x18] sm:$0xff]  }
 0x177   :  { %3561 = vmatprep.subr.bf16.mxu0 %v3845_v5 }
 0x178   :  { %v4237_v18 = vadd.f32 %v3232_v17, %v1308_v60  ;;  %3562 = vmatpush3.bf16.msra.mxu0 %v3845_v5 }
 0x179   :  { %3563 = vmatprep.subr.bf16.mxu0 %v3846_v27 }
 0x17a   :  { %v3233_v19 = vpop.f32.mrb[48].mxu1  ;;  %v3297_v2 = vpop.f32.mrb[48].mxu0 }
 0x17b   :  { %v3234_v45 = vpop.f32.mrb[49].mxu1  ;;  %v3298_v34 = vpop.f32.mrb[49].mxu0 }
 0x17c   :  { %v3235_v30 = vadd.f32 %v3234_v45, %v3233_v19  ;;  %v3299_v9 = vadd.f32 %v3298_v34, %v3297_v2  ;;  %v3236_v33 = vpop.f32.mrb[50].mxu1  ;;  %v3300_v35 = vpop.f32.mrb[50].mxu0  ;;  %3564 = vmatpush3.bf16.msra.mxu0 %v3846_v27 }
 0x17d   :  { %v3237_v56 = vpop.f32.mrb[51].mxu1  ;;  %v3301_v36 = vpop.f32.mrb[51].mxu0 }
 0x17e   :  { %v4242_v39 = vadd.f32 %v3235_v30, %v1313_v20  ;;  %v3238_v15 = vadd.f32 %v3237_v56, %v3236_v33  ;;  %v3302_v40 = vadd.f32 %v3301_v36, %v3300_v35  ;;  %v4245_v4 = vadd.f32 %v3299_v9, %v4157_v44 }
 0x17f   :  { %v1321_v44 = vadd.f32 %v4208_v14, %v4149_v31 }
 0x180   :  { %v4247_v43 = vadd.f32 %v3238_v15, %v1316_v42  ;;  %v4250_v49 = vadd.f32 %v3302_v40, %v4164_v47 }
 0x182   :  { %v3239_v22 = vpop.f32.mrb[52].mxu1  ;;  %v3303_v53 = vpop.f32.mrb[52].mxu0 }
 0x183   :  { %v3240_v57 = vpop.f32.mrb[53].mxu1  ;;  %v3304_v58 = vpop.f32.mrb[53].mxu0 }
 0x184   :  { %v3241_v13 = vadd.f32 %v3240_v57, %v3239_v22  ;;  %v3305_v47 = vadd.f32 %v3304_v58, %v3303_v53  ;;  %v3242_v59 = vpop.f32.mrb[54].mxu1  ;;  %v3306_v62 = vpop.f32.mrb[54].mxu0 }
 0x185   :  { %v3243_v24 = vpop.f32.mrb[55].mxu1  ;;  %v3307_v11 = vpop.f32.mrb[55].mxu0 }
 0x186   :  { %v4265_v60 = vadd.f32 %v3241_v13, %v1321_v44  ;;  %v3244_v17 = vadd.f32 %v3243_v24, %v3242_v59  ;;  %v3308_v19 = vadd.f32 %v3307_v11, %v3306_v62  ;;  %v4268_v14 = vadd.f32 %v3305_v47, %v4172_v1 }
 0x187   :  { %v1329_v1 = vadd.f32 %v4219_v38, %v4149_v31 }
 0x188   :  { %v4270_v2 = vadd.f32 %v3244_v17, %v1324_v8  ;;  %v4273_v45 = vadd.f32 %v3308_v19, %v4174_v6  ;;  %v1332_v6 = vadd.f32 %v4224_v51, %v4149_v31  ;;  %v1337_v51 = vadd.f32 %v4230_v28, %v4149_v31 }
 0x18a   :  { %v3245_v34 = vpop.f32.mrb[56].mxu1  ;;  %v3309_v20 = vpop.f32.mrb[56].mxu0 }
 0x18b   :  { %v3246_v30 = vpop.f32.mrb[57].mxu1  ;;  %v3310_v9 = vpop.f32.mrb[57].mxu0 }
 0x18c   :  { %v3247_v33 = vadd.f32 %v3246_v30, %v3245_v34  ;;  %v3311_v35 = vadd.f32 %v3310_v9, %v3309_v20  ;;  %v3248_v42 = vpop.f32.mrb[58].mxu1  ;;  %v3312_v56 = vpop.f32.mrb[58].mxu0 }
 0x18d   :  { %v3249_v36 = vpop.f32.mrb[59].mxu1  ;;  %v3313_v15 = vpop.f32.mrb[59].mxu0 }
 0x18e   :  { %v4282_v40 = vadd.f32 %v3247_v33, %v1329_v1  ;;  %v3250_v55 = vadd.f32 %v3249_v36, %v3248_v42  ;;  %v3314_v0 = vadd.f32 %v3313_v15, %v3312_v56  ;;  %v4285_v22 = vadd.f32 %v3311_v35, %v4182_v21 }
 0x18f   :  { %v1340_v21 = vadd.f32 %v4235_v12, %v4149_v31  ;;  %v1345_v12 = vadd.f32 %v4104_v48, %v4149_v31 }
 0x190   :  { %v4287_v53 = vadd.f32 %v3250_v55, %v1332_v6  ;;  %v4290_v38 = vadd.f32 %v3314_v0, %v4184_v26 }
 0x192   :  { %v3251_v57 = vpop.f32.mrb[60].mxu1  ;;  %v3315_v58 = vpop.f32.mrb[60].mxu0 }
 0x193   :  { %v3252_v44 = vpop.f32.mrb[61].mxu1  ;;  %v3316_v13 = vpop.f32.mrb[61].mxu0 }
 0x194   :  { %v3253_v47 = vadd.f32 %v3252_v44, %v3251_v57  ;;  %v3317_v59 = vadd.f32 %v3316_v13, %v3315_v58  ;;  %v3254_v62 = vpop.f32.mrb[62].mxu1  ;;  %v3318_v5 = vpop.f32.mrb[62].mxu0 }
 0x195   :  { %v3255_v8 = vpop.f32.mrb[63].mxu1  ;;  %v3319_v24 = vpop.f32.mrb[63].mxu0 }
 0x196   :  { %v4296_v11 = vadd.f32 %v3253_v47, %v1337_v51  ;;  %v3256_v26 = vadd.f32 %v3255_v8, %v3254_v62  ;;  %v3320_v17 = vadd.f32 %v3319_v24, %v3318_v5  ;;  %v4299_v19 = vadd.f32 %v3317_v59, %v4192_v41 }
 0x197   :  { %v1348_v41 = vadd.f32 %v4108_v54, %v4149_v31  ;;  %v1353_v54 = vadd.f32 %v4115_v61, %v4149_v31 }
 0x198   :  { %v4301_v27 = vadd.f32 %v3256_v26, %v1340_v21  ;;  %v4304_v28 = vadd.f32 %v3320_v17, %v4194_v46 }
 0x19a   :  { %v3257_v34 = vpop.f32.mrb[64].mxu1  ;;  %v3321_v20 = vpop.f32.mrb[64].mxu0 }
 0x19b   :  { %v3258_v30 = vpop.f32.mrb[65].mxu1  ;;  %v3322_v9 = vpop.f32.mrb[65].mxu0 }
 0x19c   :  { %v3259_v1 = vadd.f32 %v3258_v30, %v3257_v34  ;;  %v3323_v33 = vadd.f32 %v3322_v9, %v3321_v20  ;;  %v3260_v35 = vpop.f32.mrb[66].mxu1  ;;  %v3324_v42 = vpop.f32.mrb[66].mxu0 }
 0x19d   :  { %v3261_v56 = vpop.f32.mrb[67].mxu1  ;;  %v3325_v6 = vpop.f32.mrb[67].mxu0 }
 0x19e   :  { %v4310_v36 = vadd.f32 %v3259_v1, %v1345_v12  ;;  %v3262_v46 = vadd.f32 %v3261_v56, %v3260_v35  ;;  %v3326_v15 = vadd.f32 %v3325_v6, %v3324_v42  ;;  %v4313_v55 = vadd.f32 %v3323_v33, %v4202_v63 }
 0x19f   :  { %v1356_v63 = vadd.f32 %v4119_v3, %v4149_v31  ;;  %v1361_v3 = vadd.f32 %v4126_v10, %v4149_v31 }
 0x1a0   :  { %v4315_v0 = vadd.f32 %v3262_v46, %v1348_v41  ;;  %v4318_v48 = vadd.f32 %v3326_v15, %v4204_v7 }
 0x1a2   :  { %v3263_v57 = vpop.f32.mrb[68].mxu1  ;;  %v3327_v58 = vpop.f32.mrb[68].mxu0 }
 0x1a3   :  { %v3264_v44 = vpop.f32.mrb[69].mxu1  ;;  %v3328_v13 = vpop.f32.mrb[69].mxu0 }
 0x1a4   :  { %v3265_v51 = vadd.f32 %v3264_v44, %v3263_v57  ;;  %v3329_v47 = vadd.f32 %v3328_v13, %v3327_v58  ;;  %v3266_v59 = vpop.f32.mrb[70].mxu1  ;;  %v3330_v62 = vpop.f32.mrb[70].mxu0 }
 0x1a5   :  { %v3267_v5 = vpop.f32.mrb[71].mxu1  ;;  %v3331_v21 = vpop.f32.mrb[71].mxu0 }
 0x1a6   :  { %v4324_v8 = vadd.f32 %v3265_v51, %v1353_v54  ;;  %v3268_v7 = vadd.f32 %v3267_v5, %v3266_v59  ;;  %v3332_v24 = vadd.f32 %v3331_v21, %v3330_v62  ;;  %v4327_v26 = vadd.f32 %v3329_v47, %v4211_v25 }
 0x1a7   :  { %v1364_v25 = vadd.f32 %v4130_v16, %v4149_v31  ;;  %v1369_v16 = vadd.f32 %v4137_v23, %v4149_v31 }
 0x1a8   :  { %v4329_v17 = vadd.f32 %v3268_v7, %v1356_v63  ;;  %v4332_v61 = vadd.f32 %v3332_v24, %v4215_v32 }
 0x1aa   :  { %v3269_v34 = vpop.f32.mrb[72].mxu1  ;;  %v3333_v20 = vpop.f32.mrb[72].mxu0 }
 0x1ab   :  { %v3270_v30 = vpop.f32.mrb[73].mxu1  ;;  %v3334_v9 = vpop.f32.mrb[73].mxu0 }
 0x1ac   :  { %v3271_v12 = vadd.f32 %v3270_v30, %v3269_v34  ;;  %v3335_v1 = vadd.f32 %v3334_v9, %v3333_v20  ;;  %v3272_v33 = vpop.f32.mrb[74].mxu1  ;;  %v3336_v35 = vpop.f32.mrb[74].mxu0 }
 0x1ad   :  { %v3273_v42 = vpop.f32.mrb[75].mxu1  ;;  %v3337_v41 = vpop.f32.mrb[75].mxu0 }
 0x1ae   :  { %v4338_v56 = vadd.f32 %v3271_v12, %v1361_v3  ;;  %v3274_v32 = vadd.f32 %v3273_v42, %v3272_v33  ;;  %v3338_v6 = vadd.f32 %v3337_v41, %v3336_v35  ;;  %v4341_v46 = vadd.f32 %v3335_v1, %v4222_v50 }
 0x1af   :  { %v1372_v50 = vadd.f32 %v4141_v29, %v4149_v31 }
 0x1b0   :  { %v4343_v15 = vadd.f32 %v3274_v32, %v1364_v25  ;;  %v4346_v10 = vadd.f32 %v3338_v6, %v4226_v52 }
 0x1b2   :  { %v3275_v57 = vpop.f32.mrb[76].mxu1  ;;  %v3339_v58 = vpop.f32.mrb[76].mxu0 }
 0x1b3   :  { %v3276_v44 = vpop.f32.mrb[77].mxu1  ;;  %v3340_v13 = vpop.f32.mrb[77].mxu0 }
 0x1b4   :  { %v3277_v54 = vadd.f32 %v3276_v44, %v3275_v57  ;;  %v3341_v51 = vadd.f32 %v3340_v13, %v3339_v58  ;;  %v3278_v47 = vpop.f32.mrb[78].mxu1  ;;  %v3342_v59 = vpop.f32.mrb[78].mxu0 }
 0x1b5   :  { %v3279_v62 = vpop.f32.mrb[79].mxu1  ;;  %v3343_v63 = vpop.f32.mrb[79].mxu0 }
 0x1b6   :  { %v4352_v5 = vadd.f32 %v3277_v54, %v1369_v16  ;;  %v3280_v52 = vadd.f32 %v3279_v62, %v3278_v47  ;;  %v3344_v21 = vadd.f32 %v3343_v63, %v3342_v59  ;;  %v4355_v7 = vadd.f32 %v3341_v51, %v4233_v37 }
 0x1b8   :  { %v4357_v24 = vadd.f32 %v3280_v52, %v1372_v50  ;;  %v4360_v23 = vadd.f32 %v3344_v21, %v4237_v18 }
 0x1ba   :  { %v3345_v34 = vpop.f32.mrb[80].mxu0  ;;  %v3479_v20 = vpop.f32.mrb[80].mxu1 }
 0x1bb   :  { %v1740_v30 = vadd.f32 %v3479_v20, %v4268_v14  ;;  %v3346_v9 = vpop.f32.mrb[81].mxu0  ;;  %v1731_v29 = vpop.f32.mrb[81].mxu1 }
 0x1bc   :  { %v3347_v31 = vadd.f32 %v3346_v9, %v3345_v34  ;;  %v1732_v3 = vadd.f32 %v1731_v29, %v4245_v4  ;;  %v3348_v12 = vpop.f32.mrb[82].mxu0  ;;  %v3480_v1 = vpop.f32.mrb[82].mxu1 }
 0x1bd   :  { %v1743_v33 = vadd.f32 %v3480_v1, %v4273_v45  ;;  %v3349_v37 = vpop.f32.mrb[83].mxu0  ;;  %v1734_v35 = vpop.f32.mrb[83].mxu1  ;;  %v1860_v41 = vmax.f32 %v1740_v30, 0.0 }
 0x1be   :  { %v3350_v25 = vadd.f32 %v3349_v37, %v3348_v12  ;;  %v1735_v42 = vadd.f32 %v1734_v35, %v4250_v49  ;;  %v4367_v18 = vadd.f32 %v3347_v31, %v4242_v39  ;;  %v1858_v14 = vmax.f32 %v1732_v3, 0.0 }
 0x1bf   :  { %v1861_v32 = vmax.f32 %v1743_v33, 0.0 }
 0x1c0   :  { %v1859_v6 = vmax.f32 %v1735_v42, 0.0  ;;  %v4370_v57 = vadd.f32 %v3350_v25, %v4247_v43 }
 0x1c1   :  { %v1891_v4 = vpack.c.bf16 %v1861_v32, %v1860_v41 }
 0x1c2   :  { %v1890_v58 = vpack.c.bf16 %v1859_v6, %v1858_v14  ;;  %v3351_v44 = vpop.f32.mrb[84].mxu0  ;;  %v3483_v13 = vpop.f32.mrb[84].mxu1 }
 0x1c3   :  { %v1756_v45 = vadd.f32 %v3483_v13, %v4299_v19  ;;  %v3352_v16 = vpop.f32.mrb[85].mxu0  ;;  %v1747_v54 = vpop.f32.mrb[85].mxu1 }
 0x1c4   :  { %v3353_v51 = vadd.f32 %v3352_v16, %v3351_v44  ;;  %v1748_v49 = vadd.f32 %v1747_v54, %v4285_v22  ;;  %v3354_v39 = vpop.f32.mrb[86].mxu0  ;;  %v3484_v47 = vpop.f32.mrb[86].mxu1  ;;  %3525 = vmatprep.mubr.bf16.mxu1 %v1890_v58 }
 0x1c5   :  { %v1759_v59 = vadd.f32 %v3484_v47, %v4304_v28  ;;  %v3355_v50 = vpop.f32.mrb[87].mxu0  ;;  %v1750_v62 = vpop.f32.mrb[87].mxu1  ;;  %3526 = vmatmul.mubr.bf16.vlgmr.msra.gmra.mrb[112].mxu1 %v1891_v4  ;;  %v1864_v21 = vmax.f32 %v1756_v45, 0.0 }
 0x1c6   :  { %v3356_v43 = vadd.f32 %v3355_v50, %v3354_v39  ;;  %v1751_v63 = vadd.f32 %v1750_v62, %v4290_v38  ;;  %v1643_v52 = vadd.f32 %v3353_v51, %v4265_v60  ;;  %v1862_v34 = vmax.f32 %v1748_v49, 0.0 }
 0x1c7   :  { %v1865_v19 = vmax.f32 %v1759_v59, 0.0 }
 0x1c8   :  { %v1863_v20 = vmax.f32 %v1751_v63, 0.0  ;;  %v1646_v30 = vadd.f32 %v3356_v43, %v4270_v2 }
 0x1c9   :  { %v1893_v22 = vpack.c.bf16 %v1865_v19, %v1864_v21 }
 0x1ca   :  { %v1892_v9 = vpack.c.bf16 %v1863_v20, %v1862_v34  ;;  %v3357_v29 = vpop.f32.mrb[88].mxu0  ;;  %v3487_v31 = vpop.f32.mrb[88].mxu1 }
 0x1cb   :  { %v1772_v28 = vadd.f32 %v3487_v31, %v4327_v26  ;;  %v3358_v3 = vpop.f32.mrb[89].mxu0  ;;  %v1763_v12 = vpop.f32.mrb[89].mxu1 }
 0x1cc   :  { %v3359_v1 = vadd.f32 %v3358_v3, %v3357_v29  ;;  %v1764_v33 = vadd.f32 %v1763_v12, %v4313_v55  ;;  %v3360_v38 = vpop.f32.mrb[90].mxu0  ;;  %v3488_v37 = vpop.f32.mrb[90].mxu1  ;;  %3529 = vmatprep.mubr.bf16.mxu1 %v1892_v9 }
 0x1cd   :  { %v1775_v60 = vadd.f32 %v3488_v37, %v4332_v61  ;;  %v3361_v35 = vpop.f32.mrb[91].mxu0  ;;  %v1766_v25 = vpop.f32.mrb[91].mxu1  ;;  %3530 = vmatmul.mubr.bf16.gmra.mrb[116].mxu1 %v1893_v22  ;;  %v1868_v32 = vmax.f32 %v1772_v28, 0.0 }
 0x1ce   :  { %v3362_v2 = vadd.f32 %v3361_v35, %v3360_v38  ;;  %v1767_v42 = vadd.f32 %v1766_v25, %v4318_v48  ;;  %v1651_v41 = vadd.f32 %v3359_v1, %v4282_v40  ;;  %v1866_v14 = vmax.f32 %v1764_v33, 0.0 }
 0x1cf   :  { %v1869_v26 = vmax.f32 %v1775_v60, 0.0 }
 0x1d0   :  { %v1867_v6 = vmax.f32 %v1767_v42, 0.0  ;;  %v4384_v4 = vadd.f32 %v3362_v2, %v4287_v53 }
 0x1d1   :  { %v1895_v55 = vpack.c.bf16 %v1869_v26, %v1868_v32 }
 0x1d2   :  { %v1894_v58 = vpack.c.bf16 %v1867_v6, %v1866_v14  ;;  %v3363_v44 = vpop.f32.mrb[92].mxu0  ;;  %v3491_v13 = vpop.f32.mrb[92].mxu1 }
 0x1d3   :  { %v1788_v61 = vadd.f32 %v3491_v13, %v4355_v7  ;;  %v3364_v45 = vpop.f32.mrb[93].mxu0  ;;  %v1779_v16 = vpop.f32.mrb[93].mxu1 }
 0x1d4   :  { %v3365_v54 = vadd.f32 %v3364_v45, %v3363_v44  ;;  %v1780_v48 = vadd.f32 %v1779_v16, %v4341_v46  ;;  %v3366_v51 = vpop.f32.mrb[94].mxu0  ;;  %v3492_v40 = vpop.f32.mrb[94].mxu1  ;;  %3533 = vmatprep.mubr.bf16.mxu1 %v1894_v58 }
 0x1d5   :  { %v1791_v49 = vadd.f32 %v3492_v40, %v4360_v23  ;;  %v3367_v39 = vpop.f32.mrb[95].mxu0  ;;  %v1782_v47 = vpop.f32.mrb[95].mxu1  ;;  %3534 = vmatmul.mubr.bf16.gmra.mrb[120].mxu1 %v1895_v55  ;;  %v1872_v62 = vmax.f32 %v1788_v61, 0.0 }
 0x1d6   :  { %v3368_v53 = vadd.f32 %v3367_v39, %v3366_v51  ;;  %v1783_v59 = vadd.f32 %v1782_v47, %v4346_v10  ;;  %v1659_v50 = vadd.f32 %v3365_v54, %v4296_v11  ;;  %v1870_v43 = vmax.f32 %v1780_v48, 0.0 }
 0x1d7   :  { %v1873_v7 = vmax.f32 %v1791_v49, 0.0 }
 0x1d8   :  { %v1871_v63 = vmax.f32 %v1783_v59, 0.0  ;;  %v1662_v21 = vadd.f32 %v3368_v53, %v4301_v27 }
 0x1d9   :  { %v1897_v46 = vpack.c.bf16 %v1873_v7, %v1872_v62 }
 0x1da   :  { %v1896_v19 = vpack.c.bf16 %v1871_v63, %v1870_v43  ;;  %v3369_v34 = vpop.f32.mrb[96].mxu0  ;;  %v3495_v20 = vpop.f32.mrb[96].mxu1 }
 0x1db   :  { %v1804_v22 = vadd.f32 %v3495_v20, %v1643_v52  ;;  %v3370_v23 = vpop.f32.mrb[97].mxu0  ;;  %v1795_v9 = vpop.f32.mrb[97].mxu1 }
 0x1dc   :  { %v3371_v29 = vadd.f32 %v3370_v23, %v3369_v34  ;;  %v1796_v31 = vadd.f32 %v1795_v9, %v4367_v18  ;;  %v3372_v28 = vpop.f32.mrb[98].mxu0  ;;  %v3496_v10 = vpop.f32.mrb[98].mxu1  ;;  %3537 = vmatprep.mubr.bf16.mxu1 %v1896_v19 }
 0x1dd   :  { %v1807_v11 = vadd.f32 %v3496_v10, %v1646_v30  ;;  %v3373_v3 = vpop.f32.mrb[99].mxu0  ;;  %v1798_v12 = vpop.f32.mrb[99].mxu1  ;;  %3538 = vmatmul.mubr.bf16.gmra.mrb[124].mxu1 %v1897_v46  ;;  %v1876_v38 = vmax.f32 %v1804_v22, 0.0 }
 0x1de   :  { %v3374_v1 = vadd.f32 %v3373_v3, %v3372_v28  ;;  %v1799_v27 = vadd.f32 %v1798_v12, %v4370_v57  ;;  %v1667_v33 = vadd.f32 %v3371_v29, %v4310_v36  ;;  %v1874_v52 = vmax.f32 %v1796_v31, 0.0 }
 0x1df   :  { %v1877_v37 = vmax.f32 %v1807_v11, 0.0 }
 0x1e0   :  { %v1875_v60 = vmax.f32 %v1799_v27, 0.0  ;;  %v1670_v35 = vadd.f32 %v3374_v1, %v4315_v0 }
 0x1e1   :  { %v1899_v25 = vpack.c.bf16 %v1877_v37, %v1876_v38 }
 0x1e2   :  { %v1898_v18 = vpack.c.bf16 %v1875_v60, %v1874_v52  ;;  %v3375_v2 = vpop.f32.mrb[100].mxu0  ;;  %v3499_v42 = vpop.f32.mrb[100].mxu1 }
 0x1e3   :  { %v1820_v32 = vadd.f32 %v3499_v42, %v1659_v50  ;;  %v3376_v30 = vpop.f32.mrb[101].mxu0  ;;  %v1811_v26 = vpop.f32.mrb[101].mxu1 }
 0x1e4   :  { %v3377_v14 = vadd.f32 %v3376_v30, %v3375_v2  ;;  %v1812_v6 = vadd.f32 %v1811_v26, %v1651_v41  ;;  %v3378_v55 = vpop.f32.mrb[102].mxu0  ;;  %v3500_v58 = vpop.f32.mrb[102].mxu1  ;;  %3541 = vmatprep.mubr.bf16.mxu1 %v1898_v18  ;;  %v4406_v26 = vld [vmem:[%s4945_s4] ss:$0 sm:$0xff] }
 0x1e5   :  { %v1823_v57 = vadd.f32 %v3500_v58, %v1662_v21  ;;  %v3379_v36 = vpop.f32.mrb[103].mxu0  ;;  %v1814_v44 = vpop.f32.mrb[103].mxu1  ;;  %3542 = vmatmul.mubr.bf16.gmra.mrb[128].mxu1 %v1899_v25  ;;  %v1880_v45 = vmax.f32 %v1820_v32, 0.0 }
 0x1e6   :  { %v3380_v13 = vadd.f32 %v3379_v36, %v3378_v55  ;;  %v1815_v61 = vadd.f32 %v1814_v44, %v4384_v4  ;;  %v1675_v0 = vadd.f32 %v3377_v14, %v4324_v8  ;;  %v1878_v54 = vmax.f32 %v1812_v6, 0.0 }
 0x1e7   :  { %v1881_v16 = vmax.f32 %v1823_v57, 0.0 }
 0x1e8   :  { %v1879_v48 = vmax.f32 %v1815_v61, 0.0  ;;  %v1678_v51 = vadd.f32 %v3380_v13, %v4329_v17 }
 0x1e9   :  { %v1901_v40 = vpack.c.bf16 %v1881_v16, %v1880_v45 }
 0x1ea   :  { %v1900_v41 = vpack.c.bf16 %v1879_v48, %v1878_v54  ;;  %v3381_v49 = vpop.f32.mrb[104].mxu0  ;;  %v3503_v39 = vpop.f32.mrb[104].mxu1 }
 0x1eb   :  { %v1836_v47 = vadd.f32 %v3503_v39, %v1675_v0  ;;  %v3382_v53 = vpop.f32.mrb[105].mxu0  ;;  %v1827_v59 = vpop.f32.mrb[105].mxu1 }
 0x1ec   :  { %v3383_v50 = vadd.f32 %v3382_v53, %v3381_v49  ;;  %v1828_v62 = vadd.f32 %v1827_v59, %v1667_v33  ;;  %v3384_v7 = vpop.f32.mrb[106].mxu0  ;;  %v3504_v43 = vpop.f32.mrb[106].mxu1  ;;  %3545 = vmatprep.mubr.bf16.mxu1 %v1900_v41 }
 0x1ed   :  { %v1839_v4 = vadd.f32 %v3504_v43, %v1678_v51  ;;  %v3385_v8 = vpop.f32.mrb[107].mxu0  ;;  %v1830_v63 = vpop.f32.mrb[107].mxu1  ;;  %3546 = vmatmul.mubr.bf16.gmra.mrb[132].mxu1 %v1901_v40  ;;  %v1884_v19 = vmax.f32 %v1836_v47, 0.0 }
 0x1ee   :  { %v3386_v21 = vadd.f32 %v3385_v8, %v3384_v7  ;;  %v1831_v46 = vadd.f32 %v1830_v63, %v1670_v35  ;;  %v1683_v17 = vadd.f32 %v3383_v50, %v4338_v56  ;;  %v1882_v20 = vmax.f32 %v1828_v62, 0.0 }
 0x1ef   :  { %v1885_v34 = vmax.f32 %v1839_v4, 0.0 }
 0x1f0   :  { %v1883_v22 = vmax.f32 %v1831_v46, 0.0  ;;  %v1686_v23 = vadd.f32 %v3386_v21, %v4343_v15 }
 0x1f1   :  { %v1903_v9 = vpack.c.bf16 %v1885_v34, %v1884_v19 }
 0x1f2   :  { %v1902_v29 = vpack.c.bf16 %v1883_v22, %v1882_v20  ;;  %v3387_v31 = vpop.f32.mrb[108].mxu0  ;;  %v3507_v28 = vpop.f32.mrb[108].mxu1 }
 0x1f3   :  { %v3388_v10 = vpop.f32.mrb[109].mxu0  ;;  %v1843_v11 = vpop.f32.mrb[109].mxu1 }
 0x1f4   :  { %v3389_v3 = vadd.f32 %v3388_v10, %v3387_v31  ;;  %v1844_v12 = vadd.f32 %v1843_v11, %v1683_v17  ;;  %v3390_v1 = vpop.f32.mrb[110].mxu0  ;;  %v3508_v27 = vpop.f32.mrb[110].mxu1  ;;  %3549 = vmatprep.mubr.bf16.mxu1 %v1902_v29 }
 0x1f5   :  { %v3391_v33 = vpop.f32.mrb[111].mxu0  ;;  %v1846_v38 = vpop.f32.mrb[111].mxu1  ;;  %3550 = vmatmul.mubr.bf16.gmra.mrb[136].mxu1 %v1903_v9 }
 0x1f6   :  { %v1691_v56 = vadd.f32 %v3389_v3, %v4352_v5  ;;  %v3392_v37 = vadd.f32 %v3391_v33, %v3390_v1  ;;  %v1847_v52 = vadd.f32 %v1846_v38, %v1686_v23  ;;  %v1886_v15 = vmax.f32 %v1844_v12, 0.0 }
 0x1f8   :  { %v1852_v60 = vadd.f32 %v3507_v28, %v1691_v56  ;;  %v1694_v35 = vadd.f32 %v3392_v37, %v4357_v24  ;;  %v1887_v25 = vmax.f32 %v1847_v52, 0.0 }
 0x1fa   :  { %v1855_v18 = vadd.f32 %v3508_v27, %v1694_v35  ;;  %v1904_v2 = vpack.c.bf16 %v1887_v25, %v1886_v15  ;;  %v1888_v42 = vmax.f32 %v1852_v60, 0.0 }
 0x1fc   :  { %v1889_v32 = vmax.f32 %v1855_v18, 0.0  ;;  %3553 = vmatprep.mubr.bf16.mxu1 %v1904_v2 }
 0x1fe   :  { %v1905_v30 = vpack.c.bf16 %v1889_v32, %v1888_v42 }
 0x200   :  { %3554 = vmatmul.mubr.bf16.gmra.mrb[140].mxu1 %v1905_v30 }
 0x298   :  { %v3527_v5 = vpop.f32.mrb[112].mxu1 }
 0x299   :  { %v2020_v14 = vadd.f32 %v3527_v5, %v4406_v26  ;;  %v2011_v6 = vpop.f32.mrb[113].mxu1 }
 0x29a   :  { %v2012_v55 = vadd.f32 %v4406_v26, %v2011_v6  ;;  %v3528_v24 = vpop.f32.mrb[114].mxu1 }
 0x29b   :  { %v2023_v58 = vadd.f32 %v3528_v24, %v4406_v26  ;;  %v2014_v57 = vpop.f32.mrb[115].mxu1  ;;  %v2140_v44 = vmax.f32 %v2020_v14, 0.0 }
 0x29c   :  { %v2015_v36 = vadd.f32 %v4406_v26, %v2014_v57  ;;  %v2138_v61 = vmax.f32 %v2012_v55, 0.0 }
 0x29d   :  { %v2141_v13 = vmax.f32 %v2023_v58, 0.0 }
 0x29e   :  { %v2139_v0 = vmax.f32 %v2015_v36, 0.0 }
 0x29f   :  { %v2171_v45 = vpack.c.bf16 %v2141_v13, %v2140_v44 }
 0x2a0   :  { %v2170_v16 = vpack.c.bf16 %v2139_v0, %v2138_v61  ;;  %v3531_v54 = vpop.f32.mrb[116].mxu1 }
 0x2a1   :  { %v2036_v48 = vadd.f32 %v3531_v54, %v4406_v26  ;;  %v2027_v51 = vpop.f32.mrb[117].mxu1 }
 0x2a2   :  { %v2028_v40 = vadd.f32 %v4406_v26, %v2027_v51  ;;  %v3532_v41 = vpop.f32.mrb[118].mxu1  ;;  %3565 = vmatprep.mubr.msk.bf16.mxu0 %vm2225_vm0, %v2170_v16 }
 0x2a3   :  { %v2039_v49 = vadd.f32 %v3532_v41, %v4406_v26  ;;  %v2030_v39 = vpop.f32.mrb[119].mxu1  ;;  %3566 = vmatmul.mubr.msk.bf16.vlgmr.msra.gmra.mrb[112].mxu0 %vm2225_vm0, %v2171_v45  ;;  %v2144_v53 = vmax.f32 %v2036_v48, 0.0 }
 0x2a4   :  { %v2031_v47 = vadd.f32 %v4406_v26, %v2030_v39  ;;  %v2142_v50 = vmax.f32 %v2028_v40, 0.0 }
 0x2a5   :  { %v2145_v59 = vmax.f32 %v2039_v49, 0.0 }
 0x2a6   :  { %v2143_v62 = vmax.f32 %v2031_v47, 0.0 }
 0x2a7   :  { %v2173_v7 = vpack.c.bf16 %v2145_v59, %v2144_v53 }
 0x2a8   :  { %v2172_v43 = vpack.c.bf16 %v2143_v62, %v2142_v50  ;;  %v3535_v4 = vpop.f32.mrb[120].mxu1 }
 0x2a9   :  { %v2052_v8 = vadd.f32 %v3535_v4, %v4406_v26  ;;  %v2043_v63 = vpop.f32.mrb[121].mxu1 }
 0x2aa   :  { %v2044_v21 = vadd.f32 %v4406_v26, %v2043_v63  ;;  %v3536_v46 = vpop.f32.mrb[122].mxu1  ;;  %3569 = vmatprep.mubr.msk.bf16.mxu0 %vm2225_vm0, %v2172_v43 }
 0x2ab   :  { %v2055_v17 = vadd.f32 %v3536_v46, %v4406_v26  ;;  %v2046_v19 = vpop.f32.mrb[123].mxu1  ;;  %3570 = vmatmul.mubr.msk.bf16.gmra.mrb[116].mxu0 %vm2225_vm0, %v2173_v7  ;;  %v2148_v20 = vmax.f32 %v2052_v8, 0.0 }
 0x2ac   :  { %v2047_v34 = vadd.f32 %v4406_v26, %v2046_v19  ;;  %v2146_v23 = vmax.f32 %v2044_v21, 0.0 }
 0x2ad   :  { %v2149_v22 = vmax.f32 %v2055_v17, 0.0 }
 0x2ae   :  { %v2147_v9 = vmax.f32 %v2047_v34, 0.0 }
 0x2af   :  { %v2175_v29 = vpack.c.bf16 %v2149_v22, %v2148_v20 }
 0x2b0   :  { %v2174_v31 = vpack.c.bf16 %v2147_v9, %v2146_v23  ;;  %v3539_v28 = vpop.f32.mrb[124].mxu1 }
 0x2b1   :  { %v2068_v10 = vadd.f32 %v3539_v28, %v4406_v26  ;;  %v2059_v11 = vpop.f32.mrb[125].mxu1 }
 0x2b2   :  { %v2060_v3 = vadd.f32 %v4406_v26, %v2059_v11  ;;  %v3540_v12 = vpop.f32.mrb[126].mxu1  ;;  %3573 = vmatprep.mubr.msk.bf16.mxu0 %vm2225_vm0, %v2174_v31 }
 0x2b3   :  { %v2071_v1 = vadd.f32 %v3540_v12, %v4406_v26  ;;  %v2062_v27 = vpop.f32.mrb[127].mxu1  ;;  %3574 = vmatmul.mubr.msk.bf16.gmra.mrb[120].mxu0 %vm2225_vm0, %v2175_v29  ;;  %v2152_v38 = vmax.f32 %v2068_v10, 0.0 }
 0x2b4   :  { %v2063_v33 = vadd.f32 %v4406_v26, %v2062_v27  ;;  %v2150_v37 = vmax.f32 %v2060_v3, 0.0 }
 0x2b5   :  { %v2153_v56 = vmax.f32 %v2071_v1, 0.0 }
 0x2b6   :  { %v2151_v52 = vmax.f32 %v2063_v33, 0.0  ;;  %v4459_v33 = vld [vmem:[%s4947_s6] ss:$0 sm:$0xff] }
 0x2b7   :  { %v2177_v60 = vpack.c.bf16 %v2153_v56, %v2152_v38 }
 0x2b8   :  { %v2176_v15 = vpack.c.bf16 %v2151_v52, %v2150_v37  ;;  %v3543_v35 = vpop.f32.mrb[128].mxu1 }
 0x2b9   :  { %v2084_v25 = vadd.f32 %v3543_v35, %v4406_v26  ;;  %v2075_v18 = vpop.f32.mrb[129].mxu1 }
 0x2ba   :  { %v2076_v2 = vadd.f32 %v4406_v26, %v2075_v18  ;;  %v3544_v42 = vpop.f32.mrb[130].mxu1  ;;  %3577 = vmatprep.mubr.msk.bf16.mxu0 %vm2225_vm0, %v2176_v15 }
 0x2bb   :  { %v2087_v32 = vadd.f32 %v3544_v42, %v4406_v26  ;;  %v2078_v30 = vpop.f32.mrb[131].mxu1  ;;  %3578 = vmatmul.mubr.msk.bf16.gmra.mrb[124].mxu0 %vm2225_vm0, %v2177_v60  ;;  %v2156_v14 = vmax.f32 %v2084_v25, 0.0 }
 0x2bc   :  { %v2079_v5 = vadd.f32 %v4406_v26, %v2078_v30  ;;  %v2154_v55 = vmax.f32 %v2076_v2, 0.0 }
 0x2bd   :  { %v2157_v6 = vmax.f32 %v2087_v32, 0.0 }
 0x2be   :  { %v2155_v24 = vmax.f32 %v2079_v5, 0.0 }
 0x2bf   :  { %v2179_v58 = vpack.c.bf16 %v2157_v6, %v2156_v14 }
 0x2c0   :  { %v2178_v57 = vpack.c.bf16 %v2155_v24, %v2154_v55  ;;  %v3547_v36 = vpop.f32.mrb[132].mxu1 }
 0x2c1   :  { %v2100_v44 = vadd.f32 %v3547_v36, %v4406_v26  ;;  %v2091_v13 = vpop.f32.mrb[133].mxu1 }
 0x2c2   :  { %v2092_v61 = vadd.f32 %v4406_v26, %v2091_v13  ;;  %v3548_v0 = vpop.f32.mrb[134].mxu1  ;;  %3581 = vmatprep.mubr.msk.bf16.mxu0 %vm2225_vm0, %v2178_v57 }
 0x2c3   :  { %v2103_v45 = vadd.f32 %v3548_v0, %v4406_v26  ;;  %v2094_v16 = vpop.f32.mrb[135].mxu1  ;;  %3582 = vmatmul.mubr.msk.bf16.gmra.mrb[128].mxu0 %vm2225_vm0, %v2179_v58  ;;  %v2160_v48 = vmax.f32 %v2100_v44, 0.0 }
 0x2c4   :  { %v2095_v54 = vadd.f32 %v4406_v26, %v2094_v16  ;;  %v2158_v40 = vmax.f32 %v2092_v61, 0.0 }
 0x2c5   :  { %v2161_v51 = vmax.f32 %v2103_v45, 0.0 }
 0x2c6   :  { %v2159_v41 = vmax.f32 %v2095_v54, 0.0 }
 0x2c7   :  { %v2181_v49 = vpack.c.bf16 %v2161_v51, %v2160_v48 }
 0x2c8   :  { %v2180_v39 = vpack.c.bf16 %v2159_v41, %v2158_v40  ;;  %v3551_v47 = vpop.f32.mrb[136].mxu1 }
 0x2c9   :  { %v2116_v53 = vadd.f32 %v3551_v47, %v4406_v26  ;;  %v2107_v59 = vpop.f32.mrb[137].mxu1 }
 0x2ca   :  { %v2108_v50 = vadd.f32 %v4406_v26, %v2107_v59  ;;  %v3552_v62 = vpop.f32.mrb[138].mxu1  ;;  %3585 = vmatprep.mubr.msk.bf16.mxu0 %vm2225_vm0, %v2180_v39 }
 0x2cb   :  { %v2119_v7 = vadd.f32 %v3552_v62, %v4406_v26  ;;  %v2110_v43 = vpop.f32.mrb[139].mxu1  ;;  %3586 = vmatmul.mubr.msk.bf16.gmra.mrb[132].mxu0 %vm2225_vm0, %v2181_v49  ;;  %v2164_v8 = vmax.f32 %v2116_v53, 0.0 }
 0x2cc   :  { %v2111_v4 = vadd.f32 %v4406_v26, %v2110_v43  ;;  %v2162_v21 = vmax.f32 %v2108_v50, 0.0 }
 0x2cd   :  { %v2165_v63 = vmax.f32 %v2119_v7, 0.0 }
 0x2ce   :  { %v2163_v46 = vmax.f32 %v2111_v4, 0.0 }
 0x2cf   :  { %v2183_v17 = vpack.c.bf16 %v2165_v63, %v2164_v8 }
 0x2d0   :  { %v2182_v19 = vpack.c.bf16 %v2163_v46, %v2162_v21 }
 0x2d2   :  { %3589 = vmatprep.mubr.msk.bf16.mxu0 %vm2225_vm0, %v2182_v19 }
 0x2d3   :  { %v3555_v34 = vpop.f32.mrb[140].mxu1  ;;  %3590 = vmatmul.mubr.msk.bf16.gmra.mrb[136].mxu0 %vm2225_vm0, %v2183_v17 }
 0x2d4   :  { %v2132_v20 = vadd.f32 %v3555_v34, %v4406_v26  ;;  %v2123_v22 = vpop.f32.mrb[141].mxu1 }
 0x2d5   :  { %v2124_v23 = vadd.f32 %v4406_v26, %v2123_v22  ;;  %v3556_v9 = vpop.f32.mrb[142].mxu1 }
 0x2d6   :  { %v2135_v29 = vadd.f32 %v3556_v9, %v4406_v26  ;;  %v2126_v31 = vpop.f32.mrb[143].mxu1  ;;  %v2168_v10 = vmax.f32 %v2132_v20, 0.0 }
 0x2d7   :  { %v2127_v28 = vadd.f32 %v4406_v26, %v2126_v31  ;;  %v2166_v3 = vmax.f32 %v2124_v23, 0.0 }
 0x2d8   :  { %v2169_v11 = vmax.f32 %v2135_v29, 0.0 }
 0x2d9   :  { %v2167_v12 = vmax.f32 %v2127_v28, 0.0 }
 0x2da   :  { %v2185_v1 = vpack.c.bf16 %v2169_v11, %v2168_v10 }
 0x2db   :  { %v2184_v27 = vpack.c.bf16 %v2167_v12, %v2166_v3 }
 0x2dd   :  { %3593 = vmatprep.mubr.msk.bf16.mxu0 %vm2225_vm0, %v2184_v27 }
 0x2de   :  { %3594 = vmatmul.mubr.msk.bf16.gmra.mrb[140].mxu0 %vm2225_vm0, %v2185_v1 }
 0x376   :  { %v3567_v38 = vpop.f32.mrb[112].mxu0 }
 0x377   :  { %v4462_v56 = vadd.f32 %v3567_v38, %v4459_v33  ;;  %v2308_v26 = vpop.f32.mrb[113].mxu0 }
 0x378   :  { %v4465_v37 = vadd.f32 %v4459_v33, %v2308_v26  ;;  %v3568_v52 = vpop.f32.mrb[114].mxu0 }
 0x379   :  { %v4468_v60 = vadd.f32 %v3568_v52, %v4459_v33  ;;  %v2311_v15 = vpop.f32.mrb[115].mxu0  ;;  %v2442_v35 = vsel %vm2435_vm1, %v4462_v56, -inf }
 0x37a   :  { %v4473_v25 = vadd.f32 %v4459_v33, %v2311_v15  ;;  %2443 = vmax.xlane.f32.xlu1 %v2442_v35  ;;  %v2436_v18 = vsel %vm2435_vm1, %v4465_v37, -inf }
 0x37b   :  { %2437 = vmax.xlane.f32.xlu0 %v2436_v18  ;;  %v2445_v2 = vsel %vm2435_vm1, %v4468_v60, -inf }
 0x37c   :  { %v2439_v32 = vsel %vm2435_vm1, %v4473_v25, -inf }
 0x37e   :  { %2446 = vmax.xlane.f32.xlu1 %v2445_v2  ;;  %v3571_v42 = vpop.f32.mrb[116].mxu0 }
 0x37f   :  { %v4482_v30 = vadd.f32 %v3571_v42, %v4459_v33  ;;  %v2324_v5 = vpop.f32.mrb[117].mxu0  ;;  %2440 = vmax.xlane.f32.xlu0 %v2439_v32 }
 0x380   :  { %v3572_v14 = vpop.f32.mrb[118].mxu0  ;;  %v4490_v58 = vadd.f32 %v4459_v33, %v2324_v5 }
 0x381   :  { %v4485_v6 = vadd.f32 %v3572_v14, %v4459_v33  ;;  %v2327_v55 = vpop.f32.mrb[119].mxu0  ;;  %v2454_v24 = vsel %vm2435_vm1, %v4482_v30, -inf }
 0x382   :  { %v4493_v57 = vadd.f32 %v4459_v33, %v2327_v55  ;;  %v2448_v13 = vsel %vm2435_vm1, %v4490_v58, -inf }
 0x383   :  { %2455 = vmax.xlane.f32.xlu0 %v2454_v24  ;;  %v2457_v36 = vsel %vm2435_vm1, %v4485_v6, -inf }
 0x384   :  { %2458 = vmax.xlane.f32.xlu1 %v2457_v36  ;;  %v2451_v45 = vsel %vm2435_vm1, %v4493_v57, -inf }
 0x386   :  { %v3575_v44 = vpop.f32.mrb[120].mxu0 }
 0x387   :  { %v4500_v61 = vadd.f32 %v3575_v44, %v4459_v33  ;;  %v2340_v0 = vpop.f32.mrb[121].mxu0  ;;  %2449 = vmax.xlane.f32.xlu0 %v2448_v13 }
 0x388   :  { %v3576_v16 = vpop.f32.mrb[122].mxu0  ;;  %2452 = vmax.xlane.f32.xlu1 %v2451_v45  ;;  %v4510_v40 = vadd.f32 %v4459_v33, %v2340_v0 }
 0x389   :  { %v4505_v54 = vadd.f32 %v3576_v16, %v4459_v33  ;;  %v2343_v48 = vpop.f32.mrb[123].mxu0  ;;  %v2466_v51 = vsel %vm2435_vm1, %v4500_v61, -inf }
 0x38a   :  { %v4513_v41 = vadd.f32 %v4459_v33, %v2343_v48  ;;  %v2460_v47 = vsel %vm2435_vm1, %v4510_v40, -inf }
 0x38b   :  { %2467 = vmax.xlane.f32.xlu0 %v2466_v51  ;;  %v2469_v49 = vsel %vm2435_vm1, %v4505_v54, -inf }
 0x38c   :  { %2470 = vmax.xlane.f32.xlu1 %v2469_v49  ;;  %v2463_v50 = vsel %vm2435_vm1, %v4513_v41, -inf }
 0x38e   :  { %v3579_v39 = vpop.f32.mrb[124].mxu0 }
 0x38f   :  { %v4520_v53 = vadd.f32 %v3579_v39, %v4459_v33  ;;  %v2356_v59 = vpop.f32.mrb[125].mxu0  ;;  %2461 = vmax.xlane.f32.xlu0 %v2460_v47 }
 0x390   :  { %v3580_v62 = vpop.f32.mrb[126].mxu0  ;;  %2464 = vmax.xlane.f32.xlu1 %v2463_v50  ;;  %v4530_v8 = vadd.f32 %v4459_v33, %v2356_v59 }
 0x391   :  { %v4525_v7 = vadd.f32 %v3580_v62, %v4459_v33  ;;  %v2359_v43 = vpop.f32.mrb[127].mxu0  ;;  %v2478_v4 = vsel %vm2435_vm1, %v4520_v53, -inf }
 0x392   :  { %v4533_v63 = vadd.f32 %v4459_v33, %v2359_v43  ;;  %v2472_v17 = vsel %vm2435_vm1, %v4530_v8, -inf }
 0x393   :  { %2479 = vmax.xlane.f32.xlu0 %v2478_v4  ;;  %v2481_v21 = vsel %vm2435_vm1, %v4525_v7, -inf }
 0x394   :  { %2482 = vmax.xlane.f32.xlu1 %v2481_v21  ;;  %v2475_v20 = vsel %vm2435_vm1, %v4533_v63, -inf }
 0x396   :  { %v3583_v46 = vpop.f32.mrb[128].mxu0 }
 0x397   :  { %v4540_v19 = vadd.f32 %v3583_v46, %v4459_v33  ;;  %v2372_v34 = vpop.f32.mrb[129].mxu0  ;;  %2473 = vmax.xlane.f32.xlu0 %v2472_v17 }
 0x398   :  { %v3584_v22 = vpop.f32.mrb[130].mxu0  ;;  %2476 = vmax.xlane.f32.xlu1 %v2475_v20  ;;  %v4550_v31 = vadd.f32 %v4459_v33, %v2372_v34 }
 0x399   :  { %v4545_v23 = vadd.f32 %v3584_v22, %v4459_v33  ;;  %v2375_v9 = vpop.f32.mrb[131].mxu0  ;;  %v2490_v29 = vsel %vm2435_vm1, %v4540_v19, -inf }
 0x39a   :  { %v4553_v28 = vadd.f32 %v4459_v33, %v2375_v9  ;;  %v2484_v3 = vsel %vm2435_vm1, %v4550_v31, -inf }
 0x39b   :  { %2491 = vmax.xlane.f32.xlu0 %v2490_v29  ;;  %v2493_v10 = vsel %vm2435_vm1, %v4545_v23, -inf }
 0x39c   :  { %2494 = vmax.xlane.f32.xlu1 %v2493_v10  ;;  %v2487_v27 = vsel %vm2435_vm1, %v4553_v28, -inf }
 0x39e   :  { %v3587_v11 = vpop.f32.mrb[132].mxu0 }
 0x39f   :  { %v4560_v12 = vadd.f32 %v3587_v11, %v4459_v33  ;;  %v2388_v1 = vpop.f32.mrb[133].mxu0  ;;  %2485 = vmax.xlane.f32.xlu0 %v2484_v3 }
 0x3a0   :  { %v3588_v38 = vpop.f32.mrb[134].mxu0  ;;  %2488 = vmax.xlane.f32.xlu1 %v2487_v27  ;;  %v4570_v35 = vadd.f32 %v4459_v33, %v2388_v1 }
 0x3a1   :  { %v4565_v26 = vadd.f32 %v3588_v38, %v4459_v33  ;;  %v2391_v52 = vpop.f32.mrb[135].mxu0  ;;  %v2502_v15 = vsel %vm2435_vm1, %v4560_v12, -inf }
 0x3a2   :  { %v4573_v18 = vadd.f32 %v4459_v33, %v2391_v52  ;;  %v2496_v32 = vsel %vm2435_vm1, %v4570_v35, -inf }
 0x3a3   :  { %2503 = vmax.xlane.f32.xlu0 %v2502_v15  ;;  %v2505_v2 = vsel %vm2435_vm1, %v4565_v26, -inf }
 0x3a4   :  { %2506 = vmax.xlane.f32.xlu1 %v2505_v2  ;;  %v2499_v55 = vsel %vm2435_vm1, %v4573_v18, -inf }
 0x3a6   :  { %v3591_v42 = vpop.f32.mrb[136].mxu0 }
 0x3a7   :  { %v4580_v5 = vadd.f32 %v3591_v42, %v4459_v33  ;;  %v2404_v14 = vpop.f32.mrb[137].mxu0  ;;  %2497 = vmax.xlane.f32.xlu0 %v2496_v32 }
 0x3a8   :  { %v3592_v24 = vpop.f32.mrb[138].mxu0  ;;  %2500 = vmax.xlane.f32.xlu1 %v2499_v55  ;;  %v4590_v0 = vadd.f32 %v4459_v33, %v2404_v14 }
 0x3a9   :  { %v4585_v36 = vadd.f32 %v3592_v24, %v4459_v33  ;;  %v2407_v44 = vpop.f32.mrb[139].mxu0  ;;  %v2514_v13 = vsel %vm2435_vm1, %v4580_v5, -inf }
 0x3aa   :  { %v4593_v45 = vadd.f32 %v4459_v33, %v2407_v44  ;;  %v2508_v48 = vsel %vm2435_vm1, %v4590_v0, -inf }
 0x3ab   :  { %2515 = vmax.xlane.f32.xlu0 %v2514_v13  ;;  %v2517_v16 = vsel %vm2435_vm1, %v4585_v36, -inf }
 0x3ac   :  { %2518 = vmax.xlane.f32.xlu1 %v2517_v16  ;;  %v2511_v51 = vsel %vm2435_vm1, %v4593_v45, -inf }
 0x3af   :  { %2509 = vmax.xlane.f32.xlu0 %v2508_v48 }
 0x3b0   :  { %2512 = vmax.xlane.f32.xlu1 %v2511_v51 }
 0x3b1   :  { %v3595_v49 = vpop.f32.mrb[140].mxu0 }
 0x3b2   :  { %v4602_v39 = vadd.f32 %v3595_v49, %v4459_v33  ;;  %v2420_v47 = vpop.f32.mrb[141].mxu0 }
 0x3b3   :  { %v4605_v59 = vadd.f32 %v4459_v33, %v2420_v47  ;;  %v3596_v50 = vpop.f32.mrb[142].mxu0 }
 0x3b4   :  { %v4608_v62 = vadd.f32 %v3596_v50, %v4459_v33  ;;  %v2423_v43 = vpop.f32.mrb[143].mxu0  ;;  %v2526_v17 = vsel %vm2435_vm1, %v4602_v39, -inf }
 0x3b5   :  { %v4611_v4 = vadd.f32 %v4459_v33, %v2423_v43  ;;  %v2520_v21 = vsel %vm2435_vm1, %v4605_v59, -inf }
 0x3b6   :  { %2521 = vmax.xlane.f32.xlu0 %v2520_v21  ;;  %v2529_v34 = vsel %vm2435_vm1, %v4608_v62, -inf }
 0x3b7   :  { %v2523_v46 = vsel %vm2435_vm1, %v4611_v4, -inf }
 0x3b8   :  { %2524 = vmax.xlane.f32.xlu1 %v2523_v46 }
 0x3ba   :  { %2527 = vmax.xlane.f32.xlu0 %v2526_v17 }
 0x3bc   :  { %2530 = vmax.xlane.f32.xlu1 %v2529_v34 }
 0x407   :  { %v2444_v20 = vpop.xlane.xlu1 %2443 }
 0x408   :  { %v4622_v33 = vsub.f32 %v4462_v56, %v2444_v20  ;;  %v2438_v22 = vpop.xlane.xlu0 %2437 }
 0x409   :  { %v4625_v9 = vsub.f32 %v4465_v37, %v2438_v22 }
 0x40a   :  { %v2568_v29 = vmul.f32 1.442695, %v4622_v33 }
 0x40b   :  { %v2564_v10 = vmul.f32 1.442695, %v4625_v9  ;;  %v2447_v11 = vpop.xlane.xlu1 %2446 }
 0x40c   :  { %3847 = vpow2.f32 %v2568_v29  ;;  %v4630_v3 = vsub.f32 %v4468_v60, %v2447_v11  ;;  %v2441_v1 = vpop.xlane.xlu0 %2440 }
 0x40d   :  { %v4633_v27 = vsub.f32 %v4473_v25, %v2441_v1  ;;  %3849 = vpow2.f32 %v2564_v10 }
 0x40e   :  { %v2570_v56 = vmul.f32 1.442695, %v4630_v3 }
 0x40f   :  { %v2566_v38 = vmul.f32 1.442695, %v4633_v27 }
 0x410   :  { %3851 = vpow2.f32 %v2570_v56  ;;  %v2456_v37 = vpop.xlane.xlu0 %2455 }
 0x411   :  { %v4638_v52 = vsub.f32 %v4482_v30, %v2456_v37  ;;  %v2459_v15 = vpop.xlane.xlu1 %2458  ;;  %3853 = vpow2.f32 %v2566_v38 }
 0x412   :  { %v4641_v2 = vsub.f32 %v4485_v6, %v2459_v15 }
 0x413   :  { %v2576_v60 = vmul.f32 1.442695, %v4638_v52 }
 0x414   :  { %v2578_v25 = vmul.f32 1.442695, %v4641_v2  ;;  %v2450_v42 = vpop.xlane.xlu0 %2449 }
 0x415   :  { %3855 = vpow2.f32 %v2576_v60  ;;  %v4646_v32 = vsub.f32 %v4490_v58, %v2450_v42  ;;  %v2453_v14 = vpop.xlane.xlu1 %2452 }
 0x416   :  { %v3848_v55 = vpop.eup %3847  ;;  %3857 = vpow2.f32 %v2578_v25  ;;  %v4649_v30 = vsub.f32 %v4493_v57, %v2453_v14 }
 0x417   :  { %v2572_v24 = vmul.f32 1.442695, %v4646_v32  ;;  %v2634_v6 = vsel %vm2435_vm1, %v3848_v55, 0.0  ;;  %v3850_v44 = vpop.eup %3849 }
 0x418   :  { %v2574_v13 = vmul.f32 1.442695, %v4649_v30  ;;  %2635 = vadd.xlane.f32.xlu0 %v2634_v6  ;;  %v2468_v16 = vpop.xlane.xlu0 %2467  ;;  %v2628_v50 = vsel %vm2435_vm1, %v3850_v44, 0.0 }
 0x419   :  { %3859 = vpow2.f32 %v2572_v24  ;;  %v4655_v48 = vsub.f32 %v4500_v61, %v2468_v16  ;;  %v2471_v58 = vpop.xlane.xlu1 %2470 }
 0x41a   :  { %v3852_v51 = vpop.eup %3851  ;;  %3861 = vpow2.f32 %v2574_v13  ;;  %v4658_v49 = vsub.f32 %v4505_v54, %v2471_v58 }
 0x41b   :  { %v2584_v57 = vmul.f32 1.442695, %v4655_v48  ;;  %v2637_v47 = vsel %vm2435_vm1, %v3852_v51, 0.0  ;;  %v3854_v43 = vpop.eup %3853 }
 0x41c   :  { %v2586_v21 = vmul.f32 1.442695, %v4658_v49  ;;  %2638 = vadd.xlane.f32.xlu1 %v2637_v47  ;;  %2629 = vadd.xlane.f32.xlu0 %v2628_v50  ;;  %v2462_v46 = vpop.xlane.xlu0 %2461  ;;  %v2631_v22 = vsel %vm2435_vm1, %v3854_v43, 0.0 }
 0x41d   :  { %3863 = vpow2.f32 %v2584_v57  ;;  %v4665_v61 = vsub.f32 %v4510_v40, %v2462_v46  ;;  %v2465_v17 = vpop.xlane.xlu1 %2464 }
 0x41e   :  { %3865 = vpow2.f32 %v2586_v21  ;;  %v4668_v54 = vsub.f32 %v4513_v41, %v2465_v17 }
 0x41f   :  { %v3856_v34 = vpop.eup %3855  ;;  %v2580_v20 = vmul.f32 1.442695, %v4665_v61 }
 0x420   :  { %v3858_v29 = vpop.eup %3857  ;;  %v2582_v10 = vmul.f32 1.442695, %v4668_v54  ;;  %2632 = vadd.xlane.f32.xlu1 %v2631_v22  ;;  %v2480_v11 = vpop.xlane.xlu0 %2479  ;;  %v2646_v1 = vsel %vm2435_vm1, %v3856_v34, 0.0 }
 0x421   :  { %3867 = vpow2.f32 %v2580_v20  ;;  %v4675_v40 = vsub.f32 %v4520_v53, %v2480_v11  ;;  %v2483_v56 = vpop.xlane.xlu1 %2482  ;;  %2647 = vadd.xlane.f32.xlu0 %v2646_v1  ;;  %v2649_v15 = vsel %vm2435_vm1, %v3858_v29, 0.0 }
 0x422   :  { %3869 = vpow2.f32 %v2582_v10  ;;  %v4678_v41 = vsub.f32 %v4525_v7, %v2483_v56 }
 0x423   :  { %v3860_v38 = vpop.eup %3859  ;;  %v2592_v37 = vmul.f32 1.442695, %v4675_v40 }
 0x424   :  { %v3862_v60 = vpop.eup %3861  ;;  %v2594_v25 = vmul.f32 1.442695, %v4678_v41  ;;  %2650 = vadd.xlane.f32.xlu1 %v2649_v15  ;;  %v2474_v42 = vpop.xlane.xlu0 %2473  ;;  %v2640_v14 = vsel %vm2435_vm1, %v3860_v38, 0.0 }
 0x425   :  { %3871 = vpow2.f32 %v2592_v37  ;;  %v4685_v53 = vsub.f32 %v4530_v8, %v2474_v42  ;;  %v2477_v55 = vpop.xlane.xlu1 %2476  ;;  %2641 = vadd.xlane.f32.xlu0 %v2640_v14  ;;  %v2643_v44 = vsel %vm2435_vm1, %v3862_v60, 0.0 }
 0x426   :  { %3873 = vpow2.f32 %v2594_v25  ;;  %v4688_v7 = vsub.f32 %v4533_v63, %v2477_v55 }
 0x427   :  { %v3864_v24 = vpop.eup %3863  ;;  %v2588_v6 = vmul.f32 1.442695, %v4685_v53 }
 0x428   :  { %v3866_v13 = vpop.eup %3865  ;;  %v2590_v16 = vmul.f32 1.442695, %v4688_v7  ;;  %2644 = vadd.xlane.f32.xlu1 %v2643_v44  ;;  %v2492_v58 = vpop.xlane.xlu0 %2491  ;;  %v2658_v51 = vsel %vm2435_vm1, %v3864_v24, 0.0 }
 0x429   :  { %3875 = vpow2.f32 %v2588_v6  ;;  %v4695_v8 = vsub.f32 %v4540_v19, %v2492_v58  ;;  %v2495_v57 = vpop.xlane.xlu1 %2494  ;;  %2659 = vadd.xlane.f32.xlu0 %v2658_v51  ;;  %v2661_v43 = vsel %vm2435_vm1, %v3866_v13, 0.0 }
 0x42a   :  { %3877 = vpow2.f32 %v2590_v16  ;;  %v4698_v63 = vsub.f32 %v4545_v23, %v2495_v57 }
 0x42b   :  { %v3868_v47 = vpop.eup %3867  ;;  %v2600_v50 = vmul.f32 1.442695, %v4695_v8 }
 0x42c   :  { %v3870_v21 = vpop.eup %3869  ;;  %v2602_v46 = vmul.f32 1.442695, %v4698_v63  ;;  %2662 = vadd.xlane.f32.xlu1 %v2661_v43  ;;  %v2486_v17 = vpop.xlane.xlu0 %2485  ;;  %v2652_v34 = vsel %vm2435_vm1, %v3868_v47, 0.0 }
 0x42d   :  { %3879 = vpow2.f32 %v2600_v50  ;;  %v4705_v19 = vsub.f32 %v4550_v31, %v2486_v17  ;;  %v2489_v20 = vpop.xlane.xlu1 %2488  ;;  %2653 = vadd.xlane.f32.xlu0 %v2652_v34  ;;  %v2655_v10 = vsel %vm2435_vm1, %v3870_v21, 0.0 }
 0x42e   :  { %3881 = vpow2.f32 %v2602_v46  ;;  %v4708_v23 = vsub.f32 %v4553_v28, %v2489_v20 }
 0x42f   :  { %v3872_v22 = vpop.eup %3871  ;;  %v2596_v29 = vmul.f32 1.442695, %v4705_v19 }
 0x430   :  { %v3874_v11 = vpop.eup %3873  ;;  %v2598_v1 = vmul.f32 1.442695, %v4708_v23  ;;  %2656 = vadd.xlane.f32.xlu1 %v2655_v10  ;;  %v2504_v56 = vpop.xlane.xlu0 %2503  ;;  %v2670_v38 = vsel %vm2435_vm1, %v3872_v22, 0.0 }
 0x431   :  { %3883 = vpow2.f32 %v2596_v29  ;;  %v4715_v31 = vsub.f32 %v4560_v12, %v2504_v56  ;;  %v2507_v37 = vpop.xlane.xlu1 %2506  ;;  %2671 = vadd.xlane.f32.xlu0 %v2670_v38  ;;  %v2673_v25 = vsel %vm2435_vm1, %v3874_v11, 0.0 }
 0x432   :  { %3885 = vpow2.f32 %v2598_v1  ;;  %v4718_v28 = vsub.f32 %v4565_v26, %v2507_v37 }
 0x433   :  { %v3876_v15 = vpop.eup %3875  ;;  %v2608_v60 = vmul.f32 1.442695, %v4715_v31 }
 0x434   :  { %v3878_v42 = vpop.eup %3877  ;;  %v2610_v14 = vmul.f32 1.442695, %v4718_v28  ;;  %2674 = vadd.xlane.f32.xlu1 %v2673_v25  ;;  %v2498_v55 = vpop.xlane.xlu0 %2497  ;;  %v2664_v24 = vsel %vm2435_vm1, %v3876_v15, 0.0 }
 0x435   :  { %3887 = vpow2.f32 %v2608_v60  ;;  %v4725_v12 = vsub.f32 %v4570_v35, %v2498_v55  ;;  %v2501_v6 = vpop.xlane.xlu1 %2500  ;;  %2665 = vadd.xlane.f32.xlu0 %v2664_v24  ;;  %v2667_v16 = vsel %vm2435_vm1, %v3878_v42, 0.0 }
 0x436   :  { %3889 = vpow2.f32 %v2610_v14  ;;  %v4728_v26 = vsub.f32 %v4573_v18, %v2501_v6 }
 0x437   :  { %v3880_v44 = vpop.eup %3879  ;;  %v2604_v13 = vmul.f32 1.442695, %v4725_v12 }
 0x438   :  { %v3882_v58 = vpop.eup %3881  ;;  %v2606_v51 = vmul.f32 1.442695, %v4728_v26  ;;  %2668 = vadd.xlane.f32.xlu1 %v2667_v16  ;;  %v2516_v57 = vpop.xlane.xlu0 %2515  ;;  %v2682_v47 = vsel %vm2435_vm1, %v3880_v44, 0.0 }
 0x439   :  { %3891 = vpow2.f32 %v2604_v13  ;;  %v4735_v35 = vsub.f32 %v4580_v5, %v2516_v57  ;;  %v2519_v50 = vpop.xlane.xlu1 %2518  ;;  %2683 = vadd.xlane.f32.xlu0 %v2682_v47  ;;  %v2685_v46 = vsel %vm2435_vm1, %v3882_v58, 0.0 }
 0x43a   :  { %3893 = vpow2.f32 %v2606_v51  ;;  %v4738_v18 = vsub.f32 %v4585_v36, %v2519_v50 }
 0x43b   :  { %v3884_v43 = vpop.eup %3883  ;;  %v2616_v21 = vmul.f32 1.442695, %v4735_v35 }
 0x43c   :  { %v3886_v17 = vpop.eup %3885  ;;  %v2618_v34 = vmul.f32 1.442695, %v4738_v18  ;;  %2686 = vadd.xlane.f32.xlu1 %v2685_v46  ;;  %v2510_v20 = vpop.xlane.xlu0 %2509  ;;  %v2676_v22 = vsel %vm2435_vm1, %v3884_v43, 0.0 }
 0x43d   :  { %3895 = vpow2.f32 %v2616_v21  ;;  %v4745_v5 = vsub.f32 %v4590_v0, %v2510_v20  ;;  %v2513_v29 = vpop.xlane.xlu1 %2512  ;;  %2677 = vadd.xlane.f32.xlu0 %v2676_v22  ;;  %v2679_v1 = vsel %vm2435_vm1, %v3886_v17, 0.0 }
 0x43e   :  { %3897 = vpow2.f32 %v2618_v34  ;;  %v4748_v36 = vsub.f32 %v4593_v45, %v2513_v29 }
 0x43f   :  { %v3888_v10 = vpop.eup %3887  ;;  %v2612_v11 = vmul.f32 1.442695, %v4745_v5 }
 0x440   :  { %v3890_v56 = vpop.eup %3889  ;;  %v2614_v38 = vmul.f32 1.442695, %v4748_v36  ;;  %2680 = vadd.xlane.f32.xlu1 %v2679_v1  ;;  %v2694_v37 = vsel %vm2435_vm1, %v3888_v10, 0.0 }
 0x441   :  { %3899 = vpow2.f32 %v2612_v11  ;;  %2695 = vadd.xlane.f32.xlu0 %v2694_v37  ;;  %v2697_v60 = vsel %vm2435_vm1, %v3890_v56, 0.0 }
 0x442   :  { %3901 = vpow2.f32 %v2614_v38 }
 0x443   :  { %v3892_v0 = vpop.eup %3891  ;;  %v2522_v15 = vpop.xlane.xlu0 %2521 }
 0x444   :  { %v3894_v45 = vpop.eup %3893  ;;  %v4756_v25 = vsub.f32 %v4605_v59, %v2522_v15  ;;  %2698 = vadd.xlane.f32.xlu1 %v2697_v60  ;;  %v2688_v42 = vsel %vm2435_vm1, %v3892_v0, 0.0 }
 0x445   :  { %v2525_v14 = vpop.xlane.xlu1 %2524  ;;  %2689 = vadd.xlane.f32.xlu0 %v2688_v42  ;;  %v2691_v13 = vsel %vm2435_vm1, %v3894_v45, 0.0 }
 0x446   :  { %v2620_v55 = vmul.f32 1.442695, %v4756_v25  ;;  %v4761_v24 = vsub.f32 %v4611_v4, %v2525_v14 }
 0x447   :  { %v3896_v6 = vpop.eup %3895  ;;  %v2528_v44 = vpop.xlane.xlu0 %2527 }
 0x448   :  { %v3898_v16 = vpop.eup %3897  ;;  %3903 = vpow2.f32 %v2620_v55  ;;  %v2622_v58 = vmul.f32 1.442695, %v4761_v24  ;;  %v4766_v59 = vsub.f32 %v4602_v39, %v2528_v44  ;;  %2692 = vadd.xlane.f32.xlu1 %v2691_v13  ;;  %v2706_v51 = vsel %vm2435_vm1, %v3896_v6, 0.0 }
 0x449   :  { %v2531_v57 = vpop.xlane.xlu1 %2530  ;;  %2707 = vadd.xlane.f32.xlu0 %v2706_v51  ;;  %v2709_v43 = vsel %vm2435_vm1, %v3898_v16, 0.0 }
 0x44a   :  { %3905 = vpow2.f32 %v2622_v58  ;;  %v2624_v4 = vmul.f32 1.442695, %v4766_v59  ;;  %v4771_v47 = vsub.f32 %v4608_v62, %v2531_v57 }
 0x44b   :  { %v3900_v50 = vpop.eup %3899 }
 0x44c   :  { %v3902_v21 = vpop.eup %3901  ;;  %3907 = vpow2.f32 %v2624_v4  ;;  %v2626_v46 = vmul.f32 1.442695, %v4771_v47  ;;  %2710 = vadd.xlane.f32.xlu1 %v2709_v43  ;;  %v2700_v39 = vsel %vm2435_vm1, %v3900_v50, 0.0 }
 0x44d   :  { %2701 = vadd.xlane.f32.xlu0 %v2700_v39  ;;  %v2703_v17 = vsel %vm2435_vm1, %v3902_v21, 0.0 }
 0x44e   :  { %3909 = vpow2.f32 %v2626_v46 }
 0x450   :  { %2704 = vadd.xlane.f32.xlu1 %v2703_v17 }
 0x452   :  { %v3904_v34 = vpop.eup %3903 }
 0x453   :  { %v2712_v20 = vsel %vm2435_vm1, %v3904_v34, 0.0 }
 0x454   :  { %v3906_v62 = vpop.eup %3905  ;;  %2713 = vadd.xlane.f32.xlu0 %v2712_v20 }
 0x455   :  { %v2715_v22 = vsel %vm2435_vm1, %v3906_v62, 0.0 }
 0x456   :  { %v3908_v29 = vpop.eup %3907  ;;  %2716 = vadd.xlane.f32.xlu1 %v2715_v22 }
 0x457   :  { %v2718_v10 = vsel %vm2435_vm1, %v3908_v29, 0.0 }
 0x458   :  { %v3910_v11 = vpop.eup %3909  ;;  %2719 = vadd.xlane.f32.xlu0 %v2718_v10 }
 0x459   :  { %v2721_v1 = vsel %vm2435_vm1, %v3910_v11, 0.0 }
 0x45a   :  { %2722 = vadd.xlane.f32.xlu1 %v2721_v1 }
 0x4a5   :  { %v2636_v56 = vpop.xlane.xlu0 %2635 }
 0x4a6   :  { %3911 = vlog2.f32 %v2636_v56 }
 0x4a9   :  { %v2639_v38 = vpop.xlane.xlu1 %2638  ;;  %v2630_v37 = vpop.xlane.xlu0 %2629 }
 0x4aa   :  { %3913 = vlog2.f32 %v2639_v38 }
 0x4ab   :  { %3915 = vlog2.f32 %v2630_v37 }
 0x4ad   :  { %v2633_v0 = vpop.xlane.xlu1 %2632 }
 0x4ae   :  { %3917 = vlog2.f32 %v2633_v0  ;;  %v2648_v15 = vpop.xlane.xlu0 %2647 }
 0x4af   :  { %3919 = vlog2.f32 %v2648_v15 }
 0x4b0   :  { %v3912_v60 = vpop.eup %3911 }
 0x4b1   :  { %v2729_v45 = vmul.f32 0.6931472, %v3912_v60  ;;  %v2651_v42 = vpop.xlane.xlu1 %2650 }
 0x4b2   :  { %3921 = vlog2.f32 %v2651_v42  ;;  %v2642_v14 = vpop.xlane.xlu0 %2641 }
 0x4b3   :  { %v2790_v55 = vsub.f32 %v4622_v33, %v2729_v45  ;;  %3923 = vlog2.f32 %v2642_v14 }
 0x4b4   :  { %v3914_v6 = vpop.eup %3913 }
 0x4b5   :  { %v3916_v44 = vpop.eup %3915  ;;  %2822 = vst.msk [vmem:[%s4948_s7 + $0x10] sm:$0xff] %vm2435_vm1, %v2790_v55  ;;  %v2731_v13 = vmul.f32 0.6931472, %v3914_v6  ;;  %v2645_v16 = vpop.xlane.xlu1 %2644 }
 0x4b6   :  { %v2725_v58 = vmul.f32 0.6931472, %v3916_v44  ;;  %3925 = vlog2.f32 %v2645_v16  ;;  %v2660_v51 = vpop.xlane.xlu0 %2659 }
 0x4b7   :  { %v2791_v57 = vsub.f32 %v4630_v3, %v2731_v13  ;;  %3927 = vlog2.f32 %v2660_v51 }
 0x4b8   :  { %v3918_v4 = vpop.eup %3917  ;;  %v2788_v50 = vsub.f32 %v4625_v9, %v2725_v58 }
 0x4b9   :  { %v3920_v33 = vpop.eup %3919  ;;  %2823 = vst.msk [vmem:[%s4948_s7 + $0x18] sm:$0xff] %vm2435_vm1, %v2791_v57  ;;  %v2727_v43 = vmul.f32 0.6931472, %v3918_v4  ;;  %v2663_v21 = vpop.xlane.xlu1 %2662 }
 0x4ba   :  { %2820 = vst.msk [vmem:[%s4948_s7] sm:$0xff] %vm2435_vm1, %v2788_v50  ;;  %v2737_v46 = vmul.f32 0.6931472, %v3920_v33  ;;  %3929 = vlog2.f32 %v2663_v21  ;;  %v2654_v3 = vpop.xlane.xlu0 %2653 }
 0x4bb   :  { %v2789_v39 = vsub.f32 %v4633_v27, %v2727_v43  ;;  %3931 = vlog2.f32 %v2654_v3 }
 0x4bc   :  { %v3922_v9 = vpop.eup %3921  ;;  %v2794_v17 = vsub.f32 %v4638_v52, %v2737_v46 }
 0x4bd   :  { %v3924_v34 = vpop.eup %3923  ;;  %2821 = vst.msk [vmem:[%s4948_s7 + $0x8] sm:$0xff] %vm2435_vm1, %v2789_v39  ;;  %v2739_v20 = vmul.f32 0.6931472, %v3922_v9  ;;  %v2657_v62 = vpop.xlane.xlu1 %2656 }
 0x4be   :  { %2826 = vst.msk [vmem:[%s4948_s7 + $0x30] sm:$0xff] %vm2435_vm1, %v2794_v17  ;;  %v2733_v22 = vmul.f32 0.6931472, %v3924_v34  ;;  %3933 = vlog2.f32 %v2657_v62  ;;  %v2672_v27 = vpop.xlane.xlu0 %2671 }
 0x4bf   :  { %v2795_v29 = vsub.f32 %v4641_v2, %v2739_v20  ;;  %3935 = vlog2.f32 %v2672_v27 }
 0x4c0   :  { %v3926_v52 = vpop.eup %3925  ;;  %v2792_v10 = vsub.f32 %v4646_v32, %v2733_v22 }
 0x4c1   :  { %v3928_v11 = vpop.eup %3927  ;;  %2827 = vst.msk [vmem:[%s4948_s7 + $0x38] sm:$0xff] %vm2435_vm1, %v2795_v29  ;;  %v2735_v1 = vmul.f32 0.6931472, %v3926_v52  ;;  %v2675_v56 = vpop.xlane.xlu1 %2674 }
 0x4c2   :  { %2824 = vst.msk [vmem:[%s4948_s7 + $0x20] sm:$0xff] %vm2435_vm1, %v2792_v10  ;;  %v2745_v38 = vmul.f32 0.6931472, %v3928_v11  ;;  %3937 = vlog2.f32 %v2675_v56  ;;  %v2666_v2 = vpop.xlane.xlu0 %2665 }
 0x4c3   :  { %v2793_v37 = vsub.f32 %v4649_v30, %v2735_v1  ;;  %3939 = vlog2.f32 %v2666_v2 }
 0x4c4   :  { %v3930_v32 = vpop.eup %3929  ;;  %v2798_v0 = vsub.f32 %v4655_v48, %v2745_v38 }
 0x4c5   :  { %v3932_v15 = vpop.eup %3931  ;;  %2825 = vst.msk [vmem:[%s4948_s7 + $0x28] sm:$0xff] %vm2435_vm1, %v2793_v37  ;;  %v2747_v60 = vmul.f32 0.6931472, %v3930_v32  ;;  %v2669_v45 = vpop.xlane.xlu1 %2668 }
 0x4c6   :  { %2830 = vst.msk [vmem:[%s4948_s7 + $0x50] sm:$0xff] %vm2435_vm1, %v2798_v0  ;;  %v2741_v42 = vmul.f32 0.6931472, %v3932_v15  ;;  %3941 = vlog2.f32 %v2669_v45  ;;  %v2684_v30 = vpop.xlane.xlu0 %2683 }
 0x4c7   :  { %v2799_v14 = vsub.f32 %v4658_v49, %v2747_v60  ;;  %3943 = vlog2.f32 %v2684_v30 }
 0x4c8   :  { %v3934_v48 = vpop.eup %3933  ;;  %v2796_v55 = vsub.f32 %v4665_v61, %v2741_v42 }
 0x4c9   :  { %v3936_v6 = vpop.eup %3935  ;;  %2831 = vst.msk [vmem:[%s4948_s7 + $0x58] sm:$0xff] %vm2435_vm1, %v2799_v14  ;;  %v2743_v44 = vmul.f32 0.6931472, %v3934_v48  ;;  %v2687_v13 = vpop.xlane.xlu1 %2686 }
 0x4ca   :  { %2828 = vst.msk [vmem:[%s4948_s7 + $0x40] sm:$0xff] %vm2435_vm1, %v2796_v55  ;;  %v2753_v16 = vmul.f32 0.6931472, %v3936_v6  ;;  %3945 = vlog2.f32 %v2687_v13  ;;  %v2678_v49 = vpop.xlane.xlu0 %2677 }
 0x4cb   :  { %v2797_v58 = vsub.f32 %v4668_v54, %v2743_v44  ;;  %3947 = vlog2.f32 %v2678_v49 }
 0x4cc   :  { %v3938_v61 = vpop.eup %3937  ;;  %v2802_v51 = vsub.f32 %v4675_v40, %v2753_v16 }
 0x4cd   :  { %v3940_v57 = vpop.eup %3939  ;;  %2829 = vst.msk [vmem:[%s4948_s7 + $0x48] sm:$0xff] %vm2435_vm1, %v2797_v58  ;;  %v2755_v4 = vmul.f32 0.6931472, %v3938_v61  ;;  %v2681_v50 = vpop.xlane.xlu1 %2680 }
 0x4ce   :  { %2834 = vst.msk [vmem:[%s4948_s7 + $0x70] sm:$0xff] %vm2435_vm1, %v2802_v51  ;;  %v2749_v33 = vmul.f32 0.6931472, %v3940_v57  ;;  %3949 = vlog2.f32 %v2681_v50  ;;  %v2696_v54 = vpop.xlane.xlu0 %2695 }
 0x4cf   :  { %v2803_v43 = vsub.f32 %v4678_v41, %v2755_v4  ;;  %3951 = vlog2.f32 %v2696_v54 }
 0x4d0   :  { %v3942_v40 = vpop.eup %3941  ;;  %v2800_v21 = vsub.f32 %v4685_v53, %v2749_v33 }
 0x4d1   :  { %v3944_v46 = vpop.eup %3943  ;;  %2835 = vst.msk [vmem:[%s4948_s7 + $0x78] sm:$0xff] %vm2435_vm1, %v2803_v43  ;;  %v2751_v3 = vmul.f32 0.6931472, %v3942_v40  ;;  %v2699_v39 = vpop.xlane.xlu1 %2698 }
 0x4d2   :  { %2832 = vst.msk [vmem:[%s4948_s7 + $0x60] sm:$0xff] %vm2435_vm1, %v2800_v21  ;;  %v2761_v9 = vmul.f32 0.6931472, %v3944_v46  ;;  %3953 = vlog2.f32 %v2699_v39  ;;  %v2690_v41 = vpop.xlane.xlu0 %2689 }
 0x4d3   :  { %v2801_v17 = vsub.f32 %v4688_v7, %v2751_v3  ;;  %3955 = vlog2.f32 %v2690_v41 }
 0x4d4   :  { %v3946_v53 = vpop.eup %3945  ;;  %v2806_v34 = vsub.f32 %v4695_v8, %v2761_v9 }
 0x4d5   :  { %v3948_v20 = vpop.eup %3947  ;;  %2833 = vst.msk [vmem:[%s4948_s7 + $0x68] sm:$0xff] %vm2435_vm1, %v2801_v17  ;;  %v2763_v62 = vmul.f32 0.6931472, %v3946_v53  ;;  %v2693_v22 = vpop.xlane.xlu1 %2692 }
 0x4d6   :  { %2838 = vst.msk [vmem:[%s4948_s7 + $0x90] sm:$0xff] %vm2435_vm1, %v2806_v34  ;;  %v2757_v27 = vmul.f32 0.6931472, %v3948_v20  ;;  %3957 = vlog2.f32 %v2693_v22  ;;  %v2708_v7 = vpop.xlane.xlu0 %2707 }
 0x4d7   :  { %v2807_v29 = vsub.f32 %v4698_v63, %v2763_v62  ;;  %3959 = vlog2.f32 %v2708_v7 }
 0x4d8   :  { %v3950_v8 = vpop.eup %3949  ;;  %v2804_v52 = vsub.f32 %v4705_v19, %v2757_v27 }
 0x4d9   :  { %v3952_v10 = vpop.eup %3951  ;;  %2839 = vst.msk [vmem:[%s4948_s7 + $0x98] sm:$0xff] %vm2435_vm1, %v2807_v29  ;;  %v2759_v11 = vmul.f32 0.6931472, %v3950_v8  ;;  %v2711_v1 = vpop.xlane.xlu1 %2710 }
 0x4da   :  { %2836 = vst.msk [vmem:[%s4948_s7 + $0x80] sm:$0xff] %vm2435_vm1, %v2804_v52  ;;  %v2769_v56 = vmul.f32 0.6931472, %v3952_v10  ;;  %3961 = vlog2.f32 %v2711_v1  ;;  %v2702_v63 = vpop.xlane.xlu0 %2701 }
 0x4db   :  { %v2805_v38 = vsub.f32 %v4708_v23, %v2759_v11  ;;  %3963 = vlog2.f32 %v2702_v63 }
 0x4dc   :  { %v3954_v19 = vpop.eup %3953  ;;  %v2810_v2 = vsub.f32 %v4715_v31, %v2769_v56 }
 0x4dd   :  { %v3956_v37 = vpop.eup %3955  ;;  %2837 = vst.msk [vmem:[%s4948_s7 + $0x88] sm:$0xff] %vm2435_vm1, %v2805_v38  ;;  %v2771_v32 = vmul.f32 0.6931472, %v3954_v19  ;;  %v2705_v0 = vpop.xlane.xlu1 %2704 }
 0x4de   :  { %2842 = vst.msk [vmem:[%s4948_s7 + $0xb0] sm:$0xff] %vm2435_vm1, %v2810_v2  ;;  %v2765_v15 = vmul.f32 0.6931472, %v3956_v37  ;;  %3965 = vlog2.f32 %v2705_v0 }
 0x4df   :  { %v2811_v23 = vsub.f32 %v4718_v28, %v2771_v32 }
 0x4e0   :  { %v3958_v60 = vpop.eup %3957  ;;  %v2808_v31 = vsub.f32 %v4725_v12, %v2765_v15 }
 0x4e1   :  { %v3960_v45 = vpop.eup %3959  ;;  %2843 = vst.msk [vmem:[%s4948_s7 + $0xb8] sm:$0xff] %vm2435_vm1, %v2811_v23  ;;  %v2767_v42 = vmul.f32 0.6931472, %v3958_v60  ;;  %v2714_v30 = vpop.xlane.xlu0 %2713 }
 0x4e2   :  { %2840 = vst.msk [vmem:[%s4948_s7 + $0xa0] sm:$0xff] %vm2435_vm1, %v2808_v31  ;;  %v2777_v14 = vmul.f32 0.6931472, %v3960_v45  ;;  %3967 = vlog2.f32 %v2714_v30 }
 0x4e3   :  { %v2809_v28 = vsub.f32 %v4728_v26, %v2767_v42  ;;  %v2717_v48 = vpop.xlane.xlu1 %2716 }
 0x4e4   :  { %v3962_v55 = vpop.eup %3961  ;;  %v2814_v12 = vsub.f32 %v4735_v35, %v2777_v14  ;;  %3969 = vlog2.f32 %v2717_v48 }
 0x4e5   :  { %v3964_v6 = vpop.eup %3963  ;;  %2841 = vst.msk [vmem:[%s4948_s7 + $0xa8] sm:$0xff] %vm2435_vm1, %v2809_v28  ;;  %v2779_v44 = vmul.f32 0.6931472, %v3962_v55  ;;  %v2720_v13 = vpop.xlane.xlu0 %2719 }
 0x4e6   :  { %2846 = vst.msk [vmem:[%s4948_s7 + $0xd0] sm:$0xff] %vm2435_vm1, %v2814_v12  ;;  %v2773_v16 = vmul.f32 0.6931472, %v3964_v6  ;;  %3971 = vlog2.f32 %v2720_v13 }
 0x4e7   :  { %v2815_v26 = vsub.f32 %v4738_v18, %v2779_v44  ;;  %v2723_v49 = vpop.xlane.xlu1 %2722 }
 0x4e8   :  { %v3966_v35 = vpop.eup %3965  ;;  %v2812_v58 = vsub.f32 %v4745_v5, %v2773_v16  ;;  %3973 = vlog2.f32 %v2723_v49 }
 0x4e9   :  { %2847 = vst.msk [vmem:[%s4948_s7 + $0xd8] sm:$0xff] %vm2435_vm1, %v2815_v26  ;;  %v2775_v61 = vmul.f32 0.6931472, %v3966_v35 }
 0x4ea   :  { %2844 = vst.msk [vmem:[%s4948_s7 + $0xc0] sm:$0xff] %vm2435_vm1, %v2812_v58 }
 0x4eb   :  { %v2813_v51 = vsub.f32 %v4748_v36, %v2775_v61 }
 0x4ec   :  { %v3968_v57 = vpop.eup %3967 }
 0x4ed   :  { %2845 = vst.msk [vmem:[%s4948_s7 + $0xc8] sm:$0xff] %vm2435_vm1, %v2813_v51  ;;  %v2781_v18 = vmul.f32 0.6931472, %v3968_v57 }
 0x4ee   :  { %v3970_v5 = vpop.eup %3969 }
 0x4ef   :  { %v2816_v4 = vsub.f32 %v4756_v25, %v2781_v18  ;;  %v2783_v50 = vmul.f32 0.6931472, %v3970_v5 }
 0x4f0   :  { %v3972_v33 = vpop.eup %3971 }
 0x4f1   :  { %2848 = vst.msk [vmem:[%s4948_s7 + $0xe0] sm:$0xff] %vm2435_vm1, %v2816_v4  ;;  %v2817_v54 = vsub.f32 %v4761_v24, %v2783_v50  ;;  %v2785_v36 = vmul.f32 0.6931472, %v3972_v33 }
 0x4f2   :  { %v3974_v43 = vpop.eup %3973 }
 0x4f3   :  { %2849 = vst.msk [vmem:[%s4948_s7 + $0xe8] sm:$0xff] %vm2435_vm1, %v2817_v54  ;;  %v2818_v40 = vsub.f32 %v4766_v59, %v2785_v36  ;;  %v2787_v21 = vmul.f32 0.6931472, %v3974_v43 }
 0x4f5   :  { %2850 = vst.msk [vmem:[%s4948_s7 + $0xf0] sm:$0xff] %vm2435_vm1, %v2818_v40  ;;  %v2819_v25 = vsub.f32 %v4771_v47, %v2787_v21 }
 0x4f7   :  { %2851 = vst.msk [vmem:[%s4948_s7 + $0xf8] sm:$0xff] %vm2435_vm1, %v2819_v25 }
 0x4f8   :  { %2856 = vsyncpa [#allocation3], 1 }
 0x4f9   :  { %2857 = vsyncpa [#allocation5], 1 }

</bundles_post_ra>
